<compile_context>
chip_gen: v6e
topology: v6e:2x2x1
jax: 0.10.0
libtpu: 0.0.40
codegen_flags: <defaults>
</compile_context>

<pallas_src>
import functools
import math

import jax
import jax.numpy as jnp
from jax.experimental import pallas as pl
from jax.experimental.pallas import tpu as pltpu


# ----------------------------- in-kernel helpers -----------------------------

def _layernorm(x, gamma, beta, eps=1e-5):
    mean = jnp.mean(x, axis=-1, keepdims=True)
    var = jnp.mean((x - mean) ** 2, axis=-1, keepdims=True)
    return (x - mean) * jax.lax.rsqrt(var + eps) * gamma + beta


_GELU_C = math.sqrt(2.0 / math.pi)


def _gelu_new(x):
    # GPT-2 "gelu_new" (tanh approximation); f32 VPU/EUP math.
    return 0.5 * x * (1.0 + jnp.tanh(_GELU_C * (x + 0.044715 * x * x * x)))


# --------- fused GPT-2 stack + EOS pooling + projection + normalize ----------

def gpt2_encoder_kernel(eos_idx_ref,                                  # SMEM (scalar prefetch)
                        x_emb_ref, mask_ref,
                        ln1_g_ref, ln1_b_ref, wqkv_ref, bqkv_ref, wo_ref, bo_ref,
                        ln2_g_ref, ln2_b_ref, wfc_ref, bfc_ref, wpr_ref, bpr_ref,
                        lnf_g_ref, lnf_b_ref, wproj_ref, bproj_ref,
                        o_ref,
                        x_scr,
                        *, num_heads):
    b = pl.program_id(0)
    l = pl.program_id(1)
    TB, S, H = x_emb_ref.shape
    NH = num_heads
    hd = H // NH
    M = TB * S
    P = wproj_ref.shape[1]

    # ---- per-batch-tile init (runs once per tile, at layer 0) ----
    @pl.when(l == 0)
    def _init():
        x_scr[...] = x_emb_ref[...].reshape(M, H).astype(jnp.float32)

    x = x_scr[...]                                        # [M, H] f32 residual stream

    # Causal + key-padding additive bias, rebuilt per layer from iota + mask
    # (pure VPU work hidden under the MXU; no persistent [S,S] scratch).
    row = jax.lax.broadcasted_iota(jnp.int32, (S, S), 0)
    col = jax.lax.broadcasted_iota(jnp.int32, (S, S), 1)
    causal = (col <= row)[None, :, :]                     # [1, S, S]
    pad_ok = mask_ref[...] > 0.5                          # [TB, 1, S]
    bias = jnp.where(causal & pad_ok, 0.0, -1e9).astype(jnp.float32)   # [TB, S, S]

    # ---------------- attention ----------------
    h = _layernorm(x, ln1_g_ref[0], ln1_b_ref[0])
    qkv = (jnp.dot(h.astype(jnp.bfloat16), wqkv_ref[0],
                   preferred_element_type=jnp.float32) + bqkv_ref[0])  # [M, 3H] f32
    qkv_b = qkv.astype(jnp.bfloat16)

    wo = wo_ref[0]                                        # [H, H] bf16
    scale = 1.0 / math.sqrt(hd)
    attn = jnp.zeros((M, H), jnp.float32)
    for hi in range(NH):
        q = qkv_b[:, hi * hd:(hi + 1) * hd].reshape(TB, S, hd)
        k = qkv_b[:, H + hi * hd:H + (hi + 1) * hd].reshape(TB, S, hd)
        v = qkv_b[:, 2 * H + hi * hd:2 * H + (hi + 1) * hd].reshape(TB, S, hd)
        s = jnp.einsum('bqd,bkd->bqk', q, k,
                       preferred_element_type=jnp.float32) * scale + bias
        m = jnp.max(s, axis=-1, keepdims=True)
        e = jnp.exp(s - m)
        p = e * pl.reciprocal(jnp.sum(e, axis=-1, keepdims=True), approx=True)
        ctx = jnp.einsum('bqk,bkd->bqd', p.astype(jnp.bfloat16), v,
                         preferred_element_type=jnp.float32)           # [TB, S, hd]
        # Fold the head merge directly into the output projection
        # (no head-major scratch, no masked sub-128-lane stores).
        attn = attn + jnp.dot(ctx.reshape(M, hd).astype(jnp.bfloat16),
                              wo[hi * hd:(hi + 1) * hd, :],
                              preferred_element_type=jnp.float32)
    x = x + attn + bo_ref[0]

    # ---------------- MLP ----------------
    h2 = _layernorm(x, ln2_g_ref[0], ln2_b_ref[0])
    ff = (jnp.dot(h2.astype(jnp.bfloat16), wfc_ref[0],
                  preferred_element_type=jnp.float32) + bfc_ref[0])
    ff = _gelu_new(ff)                                    # f32
    ff = (jnp.dot(ff.astype(jnp.bfloat16), wpr_ref[0],
                  preferred_element_type=jnp.float32) + bpr_ref[0])
    x = x + ff

    x_scr[...] = x                                        # carry to next layer

    # ---- fused epilogue at the last layer: EOS pooling + ln_f +
    #      text_projection + F.normalize; writes only [TB, 1, P] ----
    @pl.when(l == pl.num_programs(1) - 1)
    def _final():
        rows = []
        for tb in range(TB):
            idx = eos_idx_ref[b * TB + tb]                # first-EOS position
            rows.append(x_scr[pl.ds(tb * S + idx, 1), :])
        pooled = jnp.concatenate(rows, axis=0)            # [TB, H] f32
        hf = _layernorm(pooled, lnf_g_ref[...], lnf_b_ref[...])
        y = (jnp.dot(hf.astype(jnp.bfloat16), wproj_ref[...],
                     preferred_element_type=jnp.float32) + bproj_ref[...])
        nsq = jnp.sum(y * y, axis=-1, keepdims=True)      # F.normalize(dim=-1)
        y = y * jax.lax.rsqrt(jnp.maximum(nsq, 1e-24))
        o_ref[...] = y.reshape(TB, 1, P).astype(o_ref.dtype)


# --------------------------------- wrapper ------------------------------------

def _vmem_limit_bytes():
    try:
        cap = int(getattr(pltpu.get_tpu_info(), "vmem_capacity_bytes",
                          128 * 1024 * 1024))
    except Exception:
        cap = 128 * 1024 * 1024
    # generation-aware: leave headroom for compiler scratch (v7x has 64 MiB/TC)
    return max(32 * 1024 * 1024, min((cap * 3) // 4, 96 * 1024 * 1024))


def _pick_batch_tile(B, S):
    # Amortize per-layer weight DMA over as many sequences as practical while
    # keeping the residual-stream working set (TB*S rows) modest.
    tb = B
    while tb > 1 and (B % tb != 0 or tb * S > 2048):
        tb -= 1
    return max(tb, 1)


def gpt2_encoder_forward(input_ids, attention_mask, params, *,
                         eos_token_id, num_heads, batch_tile=None):
    """Equivalent of Gpt2Encoder.forward on a pre-tokenized batch."""
    B, S = input_ids.shape
    H = params['wte'].shape[1]
    P = params['proj_w'].shape[1]
    L = params['wqkv'].shape[0]
    NH = num_heads
    hd = H // NH
    assert H % NH == 0

    TB = batch_tile if batch_tile is not None else _pick_batch_tile(B, S)
    assert B % TB == 0

    # Embedding lookup (glue, XLA gather) — bf16 into the stack.
    x = (params['wte'][input_ids]
         + params['wpe'][jnp.arange(S)][None, :, :]).astype(jnp.bfloat16)
    mask3 = attention_mask.astype(jnp.float32).reshape(B, 1, S)
    # indices = (input_ids == eos).argmax(dim=1)  (first EOS, else 0)
    eos_idx = jnp.argmax((input_ids == eos_token_id).astype(jnp.int32),
                         axis=1).astype(jnp.int32)

    def wspec(arr):
        zeros = (0,) * (arr.ndim - 1)
        return pl.BlockSpec((1,) + arr.shape[1:],
                            lambda bb, ll, idx, _z=zeros: (ll,) + _z)

    def fullspec(shape):
        zeros = (0,) * len(shape)
        return pl.BlockSpec(shape, lambda bb, ll, idx, _z=zeros: _z)

    in_specs = [
        pl.BlockSpec((TB, S, H), lambda bb, ll, idx: (bb, 0, 0)),   # embeddings
        pl.BlockSpec((TB, 1, S), lambda bb, ll, idx: (bb, 0, 0)),   # key-pad mask
        wspec(params['ln1_g']), wspec(params['ln1_b']),
        wspec(params['wqkv']), wspec(params['bqkv']),
        wspec(params['wo']), wspec(params['bo']),
        wspec(params['ln2_g']), wspec(params['ln2_b']),
        wspec(params['wfc']), wspec(params['bfc']),
        wspec(params['wpr']), wspec(params['bpr']),
        fullspec(params['ln_f_g'].shape), fullspec(params['ln_f_b'].shape),
        fullspec(params['proj_w'].shape), fullspec(params['proj_b'].shape),
    ]
    scratch_shapes = [pltpu.VMEM((TB * S, H), jnp.float32)]  # resident residual stream

    # Cost hint: weights are streamed once per batch tile (B//TB times total).
    n_bsteps = B // TB
    w_bytes_per_layer = (2 * (3 * H * H + H * H + 4 * H * H + 4 * H * H)
                         + 4 * (3 * H + H + 4 * H + H + 4 * H))
    flops = (2 * B * S * L * 12 * H * H
             + 4 * B * L * NH * S * S * hd
             + 2 * B * H * P)
    transcendentals = B * L * (NH * S * S + 4 * S * H)
    bytes_accessed = (n_bsteps * L * w_bytes_per_layer
                      + 2 * B * S * H + 4 * B * S + 4 * B + 4 * B * P)

    kernel = functools.partial(gpt2_encoder_kernel, num_heads=num_heads)
    out = pl.pallas_call(
        kernel,
        out_shape=jax.ShapeDtypeStruct((B, 1, P), jnp.float32),
        grid_spec=pltpu.PrefetchScalarGridSpec(
            num_scalar_prefetch=1,
            grid=(B // TB, L),
            in_specs=in_specs,
            out_specs=pl.BlockSpec((TB, 1, P), lambda bb, ll, idx: (bb, 0, 0)),
            scratch_shapes=scratch_shapes),
        compiler_params=pltpu.CompilerParams(
            dimension_semantics=("parallel", "arbitrary"),
            vmem_limit_bytes=_vmem_limit_bytes()),
        cost_estimate=pl.CostEstimate(flops=flops,
                                      transcendentals=transcendentals,
                                      bytes_accessed=bytes_accessed),
    )(eos_idx, x, mask3,
      params['ln1_g'], params['ln1_b'], params['wqkv'], params['bqkv'],
      params['wo'], params['bo'], params['ln2_g'], params['ln2_b'],
      params['wfc'], params['bfc'], params['wpr'], params['bpr'],
      params['ln_f_g'], params['ln_f_b'], params['proj_w'], params['proj_b'])
    return out.reshape(B, P)


# ------------------------------ parameter init --------------------------------

def init_params(key, *, vocab, max_pos, hidden, num_layers, proj_dim):
    std = 0.02
    H, L = hidden, num_layers
    ks = jax.random.split(key, 7)

    def nrm(k, shape, dtype=jnp.float32):
        return (std * jax.random.normal(k, shape, dtype=jnp.float32)).astype(dtype)

    return {
        'wte': nrm(ks[0], (vocab, H)),
        'wpe': nrm(ks[1], (max_pos, H)),
        'ln_f_g': jnp.ones((1, H), jnp.float32),
        'ln_f_b': jnp.zeros((1, H), jnp.float32),
        'proj_w': nrm(ks[2], (H, proj_dim), jnp.bfloat16),
        'proj_b': jnp.zeros((1, proj_dim), jnp.float32),
        # per-layer params stacked along a leading L axis; big matrices in bf16
        'ln1_g': jnp.ones((L, 1, H), jnp.float32),
        'ln1_b': jnp.zeros((L, 1, H), jnp.float32),
        'ln2_g': jnp.ones((L, 1, H), jnp.float32),
        'ln2_b': jnp.zeros((L, 1, H), jnp.float32),
        'wqkv': nrm(ks[3], (L, H, 3 * H), jnp.bfloat16),
        'bqkv': jnp.zeros((L, 1, 3 * H), jnp.float32),
        'wo': nrm(ks[4], (L, H, H), jnp.bfloat16),
        'bo': jnp.zeros((L, 1, H), jnp.float32),
        'wfc': nrm(ks[5], (L, H, 4 * H), jnp.bfloat16),
        'bfc': jnp.zeros((L, 1, 4 * H), jnp.float32),
        'wpr': nrm(ks[6], (L, 4 * H, H), jnp.bfloat16),
        'bpr': jnp.zeros((L, 1, H), jnp.float32),
    }


# ----------------------------------- main -------------------------------------

if __name__ == "__main__":
    B, S, H, NH, L = 2, 8, 32, 4, 2
    VOCAB, PROJ = 64, 16
    EOS = VOCAB - 1

    key = jax.random.PRNGKey(0)
    k_ids, k_par = jax.random.split(key)

    params = init_params(k_par, vocab=VOCAB, max_pos=S, hidden=H,
                         num_layers=L, proj_dim=PROJ)

    input_ids = jax.random.randint(k_ids, (B, S), 0, VOCAB - 1, dtype=jnp.int32)
    # place EOS tokens (mimics tokenizer output) and a padded tail on batch 1
    input_ids = input_ids.at[0, 5].set(EOS)
    input_ids = input_ids.at[1, 6].set(EOS)
    attention_mask = jnp.ones((B, S), jnp.int32)
    attention_mask = attention_mask.at[1, 7].set(0)

    # TODO(synk): tokenizer (raw text -> ids) and .to(device) have no Pallas
    # equivalent; the kernel consumes pre-tokenized input_ids/attention_mask.

    fwd = jax.jit(functools.partial(gpt2_encoder_forward,
                                    eos_token_id=EOS, num_heads=NH))
    out = fwd(input_ids, attention_mask, params)
    out = jax.block_until_ready(out)

    assert out.shape == (B, PROJ)
    assert bool(jnp.all(jnp.isfinite(out)))
    # rows are L2-normalized
    assert bool(jnp.allclose(jnp.linalg.norm(out, axis=-1), 1.0, atol=1e-4))
    print("KERNEL_OK")
</pallas_src>

<mosaic_0001>
module attributes {stable_mosaic.version = 11 : i64} {
  func.func @gpt2_encoder_kernel(%arg0: i32, %arg1: i32, %arg2: memref<2xi32, #tpu.memory_space<smem>>, %arg3: memref<2x8x32xbf16, #tpu.memory_space<vmem>>, %arg4: memref<2x1x8xf32, #tpu.memory_space<vmem>>, %arg5: memref<1x1x32xf32, #tpu.memory_space<vmem>>, %arg6: memref<1x1x32xf32, #tpu.memory_space<vmem>>, %arg7: memref<1x32x96xbf16, #tpu.memory_space<vmem>>, %arg8: memref<1x1x96xf32, #tpu.memory_space<vmem>>, %arg9: memref<1x32x32xbf16, #tpu.memory_space<vmem>>, %arg10: memref<1x1x32xf32, #tpu.memory_space<vmem>>, %arg11: memref<1x1x32xf32, #tpu.memory_space<vmem>>, %arg12: memref<1x1x32xf32, #tpu.memory_space<vmem>>, %arg13: memref<1x32x128xbf16, #tpu.memory_space<vmem>>, %arg14: memref<1x1x128xf32, #tpu.memory_space<vmem>>, %arg15: memref<1x128x32xbf16, #tpu.memory_space<vmem>>, %arg16: memref<1x1x32xf32, #tpu.memory_space<vmem>>, %arg17: memref<1x32xf32, #tpu.memory_space<vmem>>, %arg18: memref<1x32xf32, #tpu.memory_space<vmem>>, %arg19: memref<32x16xbf16, #tpu.memory_space<vmem>>, %arg20: memref<1x16xf32, #tpu.memory_space<vmem>>, %arg21: memref<2x1x16xf32, #tpu.memory_space<vmem>>, %arg22: memref<16x32xf32, #tpu.memory_space<vmem>>) attributes {dimension_semantics = [#tpu.dimension_semantics<parallel>, #tpu.dimension_semantics<arbitrary>], iteration_bounds = array<i64: 1, 2>, scalar_prefetch = 1 : i64, scratch_operands = 1 : i64, tpu.core_type = #tpu.core_type<tc>, window_params = [{transform_indices = @transform_0, window_bounds = array<i64: 2, 8, 32>}, {transform_indices = @transform_1, window_bounds = array<i64: 2, 1, 8>}, {transform_indices = @transform_2, window_bounds = array<i64: 1, 1, 32>}, {transform_indices = @transform_3, window_bounds = array<i64: 1, 1, 32>}, {transform_indices = @transform_4, window_bounds = array<i64: 1, 32, 96>}, {transform_indices = @transform_5, window_bounds = array<i64: 1, 1, 96>}, {transform_indices = @transform_6, window_bounds = array<i64: 1, 32, 32>}, {transform_indices = @transform_7, window_bounds = array<i64: 1, 1, 32>}, {transform_indices = @transform_8, window_bounds = array<i64: 1, 1, 32>}, {transform_indices = @transform_9, window_bounds = array<i64: 1, 1, 32>}, {transform_indices = @transform_10, window_bounds = array<i64: 1, 32, 128>}, {transform_indices = @transform_11, window_bounds = array<i64: 1, 1, 128>}, {transform_indices = @transform_12, window_bounds = array<i64: 1, 128, 32>}, {transform_indices = @transform_13, window_bounds = array<i64: 1, 1, 32>}, {pipeline_mode = #tpu.pipeline_mode<synchronous>, transform_indices = @transform_14, window_bounds = array<i64: 1, 32>}, {pipeline_mode = #tpu.pipeline_mode<synchronous>, transform_indices = @transform_15, window_bounds = array<i64: 1, 32>}, {pipeline_mode = #tpu.pipeline_mode<synchronous>, transform_indices = @transform_16, window_bounds = array<i64: 32, 16>}, {pipeline_mode = #tpu.pipeline_mode<synchronous>, transform_indices = @transform_17, window_bounds = array<i64: 1, 16>}, {transform_indices = @transform_18, window_bounds = array<i64: 2, 1, 16>}]} {
    %c0_i32 = arith.constant 0 : i32
    %0 = arith.cmpi eq, %arg1, %c0_i32 : i32
    %1 = arith.extui %0 : i1 to i32
    %c0_i32_0 = arith.constant 0 : i32
    %2 = arith.cmpi ne, %1, %c0_i32_0 : i32
    scf.if %2 {
      %c0_88 = arith.constant 0 : index
      %c0_89 = arith.constant 0 : index
      %c0_90 = arith.constant 0 : index
      %228 = vector.load %arg3[%c0_88, %c0_89, %c0_90] : memref<2x8x32xbf16, #tpu.memory_space<vmem>>, vector<2x8x32xbf16>
      %229 = vector.shape_cast %228 : vector<2x8x32xbf16> to vector<16x32xbf16>
      %230 = arith.extf %229 : vector<16x32xbf16> to vector<16x32xf32>
      %c0_91 = arith.constant 0 : index
      %c0_92 = arith.constant 0 : index
      %231 = vector.load %arg22[%c0_91, %c0_92] : memref<16x32xf32, #tpu.memory_space<vmem>>, vector<16x32xf32>
      tpu.vector_store %arg22[%c0_91, %c0_92], %230 {strides = array<i32>} : memref<16x32xf32, #tpu.memory_space<vmem>>, vector<16x32xf32>,
    } else {
    }
    %c0 = arith.constant 0 : index
    %c0_1 = arith.constant 0 : index
    %3 = vector.load %arg22[%c0, %c0_1] : memref<16x32xf32, #tpu.memory_space<vmem>>, vector<16x32xf32>
    %4 = tpu.iota {dimensions = array<i32: 0>} : vector<8x8xi32>
    %5 = tpu.iota {dimensions = array<i32: 1>} : vector<8x8xi32>
    %6 = arith.cmpi sle, %5, %4 : vector<8x8xi32>
    %7 = vector.shape_cast %6 : vector<8x8xi1> to vector<1x8x8xi1>
    %c0_2 = arith.constant 0 : index
    %c0_3 = arith.constant 0 : index
    %c0_4 = arith.constant 0 : index
    %8 = vector.load %arg4[%c0_2, %c0_3, %c0_4] : memref<2x1x8xf32, #tpu.memory_space<vmem>>, vector<2x1x8xf32>
    %cst = arith.constant 5.000000e-01 : f32
    %9 = vector.broadcast %cst : f32 to vector<2x1x8xf32>
    %10 = arith.cmpf ogt, %8, %9 : vector<2x1x8xf32>
    %11 = vector.broadcast %7 : vector<1x8x8xi1> to vector<2x8x8xi1>
    %12 = vector.broadcast %10 : vector<2x1x8xi1> to vector<2x8x8xi1>
    %13 = arith.andi %11, %12 : vector<2x8x8xi1>
    %cst_5 = arith.constant 0.000000e+00 : f32
    %cst_6 = arith.constant -1.000000e+09 : f32
    %14 = vector.broadcast %cst_5 : f32 to vector<2x8x8xf32>
    %15 = vector.broadcast %cst_6 : f32 to vector<2x8x8xf32>
    %16 = arith.select %13, %14, %15 : vector<2x8x8xi1>, vector<2x8x8xf32>
    %c0_7 = arith.constant 0 : index
    %c0_8 = arith.constant 0 : index
    %c0_9 = arith.constant 0 : index
    %17 = vector.load %arg5[%c0_7, %c0_8, %c0_9] : memref<1x1x32xf32, #tpu.memory_space<vmem>>, vector<1x1x32xf32>
    %18 = vector.shape_cast %17 : vector<1x1x32xf32> to vector<1x32xf32>
    %c0_10 = arith.constant 0 : index
    %c0_11 = arith.constant 0 : index
    %c0_12 = arith.constant 0 : index
    %19 = vector.load %arg6[%c0_10, %c0_11, %c0_12] : memref<1x1x32xf32, #tpu.memory_space<vmem>>, vector<1x1x32xf32>
    %20 = vector.shape_cast %19 : vector<1x1x32xf32> to vector<1x32xf32>
    %cst_13 = arith.constant dense<0.000000e+00> : vector<16xf32>
    %21 = vector.multi_reduction <add>, %3, %cst_13 [1] : vector<16x32xf32> to vector<16xf32>
    %22 = vector.shape_cast %21 : vector<16xf32> to vector<16x1xf32>
    %cst_14 = arith.constant 3.200000e+01 : f32
    %23 = vector.broadcast %cst_14 : f32 to vector<16x1xf32>
    %24 = arith.divf %22, %23 : vector<16x1xf32>
    %25 = vector.broadcast %24 : vector<16x1xf32> to vector<16x32xf32>
    %26 = arith.subf %3, %25 : vector<16x32xf32>
    %27 = arith.mulf %26, %26 : vector<16x32xf32>
    %cst_15 = arith.constant dense<0.000000e+00> : vector<16xf32>
    %28 = vector.multi_reduction <add>, %27, %cst_15 [1] : vector<16x32xf32> to vector<16xf32>
    %29 = vector.shape_cast %28 : vector<16xf32> to vector<16x1xf32>
    %cst_16 = arith.constant 3.200000e+01 : f32
    %30 = vector.broadcast %cst_16 : f32 to vector<16x1xf32>
    %31 = arith.divf %29, %30 : vector<16x1xf32>
    %32 = vector.broadcast %24 : vector<16x1xf32> to vector<16x32xf32>
    %33 = arith.subf %3, %32 : vector<16x32xf32>
    %cst_17 = arith.constant 9.99999974E-6 : f32
    %34 = vector.broadcast %cst_17 : f32 to vector<16x1xf32>
    %35 = arith.addf %31, %34 : vector<16x1xf32>
    %36 = math.rsqrt %35 : vector<16x1xf32>
    %37 = vector.broadcast %36 : vector<16x1xf32> to vector<16x32xf32>
    %38 = arith.mulf %33, %37 : vector<16x32xf32>
    %39 = vector.broadcast %18 : vector<1x32xf32> to vector<16x32xf32>
    %40 = arith.mulf %38, %39 : vector<16x32xf32>
    %41 = vector.broadcast %20 : vector<1x32xf32> to vector<16x32xf32>
    %42 = arith.addf %40, %41 : vector<16x32xf32>
    %43 = arith.truncf %42 : vector<16x32xf32> to vector<16x32xbf16>
    %c0_18 = arith.constant 0 : index
    %c0_19 = arith.constant 0 : index
    %c0_20 = arith.constant 0 : index
    %44 = vector.load %arg7[%c0_18, %c0_19, %c0_20] : memref<1x32x96xbf16, #tpu.memory_space<vmem>>, vector<1x32x96xbf16>
    %45 = vector.shape_cast %44 : vector<1x32x96xbf16> to vector<32x96xbf16>
    %cst_21 = arith.constant dense<0.000000e+00> : vector<16x96xf32>
    %46 = tpu.matmul %43, %45, %cst_21 {dimension_numbers = #tpu.dot_dimension_numbers<[1], [0], [0], [1], [0, 0, 1, 1], [], []>} : vector<16x32xbf16>, vector<32x96xbf16>, vector<16x96xf32> -> vector<16x96xf32>
    %c0_22 = arith.constant 0 : index
    %c0_23 = arith.constant 0 : index
    %c0_24 = arith.constant 0 : index
    %47 = vector.load %arg8[%c0_22, %c0_23, %c0_24] : memref<1x1x96xf32, #tpu.memory_space<vmem>>, vector<1x1x96xf32>
    %48 = vector.shape_cast %47 : vector<1x1x96xf32> to vector<1x96xf32>
    %49 = vector.broadcast %48 : vector<1x96xf32> to vector<16x96xf32>
    %50 = arith.addf %46, %49 : vector<16x96xf32>
    %51 = arith.truncf %50 : vector<16x96xf32> to vector<16x96xbf16>
    %c0_25 = arith.constant 0 : index
    %c0_26 = arith.constant 0 : index
    %c0_27 = arith.constant 0 : index
    %52 = vector.load %arg9[%c0_25, %c0_26, %c0_27] : memref<1x32x32xbf16, #tpu.memory_space<vmem>>, vector<1x32x32xbf16>
    %53 = vector.shape_cast %52 : vector<1x32x32xbf16> to vector<32x32xbf16>
    %cst_28 = arith.constant 0.000000e+00 : f32
    %54 = vector.broadcast %cst_28 : f32 to vector<16x32xf32>
    %55 = vector.extract_strided_slice %51 {offsets = [0, 0], sizes = [16, 8], strides = [1, 1]} : vector<16x96xbf16> to vector<16x8xbf16>
    %56 = vector.shape_cast %55 : vector<16x8xbf16> to vector<2x8x8xbf16>
    %57 = vector.extract_strided_slice %51 {offsets = [0, 32], sizes = [16, 8], strides = [1, 1]} : vector<16x96xbf16> to vector<16x8xbf16>
    %58 = vector.shape_cast %57 : vector<16x8xbf16> to vector<2x8x8xbf16>
    %59 = vector.extract_strided_slice %51 {offsets = [0, 64], sizes = [16, 8], strides = [1, 1]} : vector<16x96xbf16> to vector<16x8xbf16>
    %60 = vector.shape_cast %59 : vector<16x8xbf16> to vector<2x8x8xbf16>
    "tpu.trace_start"() <{level = 10 : i32, message = "bqd,bkd->bqk"}> : () -> ()
    %cst_29 = arith.constant dense<0.000000e+00> : vector<2x8x8xf32>
    %61 = tpu.matmul %56, %58, %cst_29 {dimension_numbers = #tpu.dot_dimension_numbers<[2], [2], [1], [1], [0, 0, 0, 1, 1, 1], [0], [0]>} : vector<2x8x8xbf16>, vector<2x8x8xbf16>, vector<2x8x8xf32> -> vector<2x8x8xf32>
    "tpu.trace_stop"() : () -> ()
    %cst_30 = arith.constant 0.353553385 : f32
    %62 = vector.broadcast %cst_30 : f32 to vector<2x8x8xf32>
    %63 = arith.mulf %61, %62 : vector<2x8x8xf32>
    %64 = arith.addf %63, %16 : vector<2x8x8xf32>
    %cst_31 = arith.constant dense<0xFF800000> : vector<2x8xf32>
    %65 = vector.multi_reduction <maximumf>, %64, %cst_31 [2] : vector<2x8x8xf32> to vector<2x8xf32>
    %66 = vector.shape_cast %65 : vector<2x8xf32> to vector<2x8x1xf32>
    %67 = vector.broadcast %66 : vector<2x8x1xf32> to vector<2x8x8xf32>
    %68 = arith.subf %64, %67 : vector<2x8x8xf32>
    %69 = math.exp %68 : vector<2x8x8xf32>
    %cst_32 = arith.constant dense<0.000000e+00> : vector<2x8xf32>
    %70 = vector.multi_reduction <add>, %69, %cst_32 [2] : vector<2x8x8xf32> to vector<2x8xf32>
    %71 = vector.shape_cast %70 : vector<2x8xf32> to vector<2x8x1xf32>
    %72 = tpu.reciprocal %71 {approx = true} : vector<2x8x1xf32> -> vector<2x8x1xf32>
    %73 = vector.broadcast %72 : vector<2x8x1xf32> to vector<2x8x8xf32>
    %74 = arith.mulf %69, %73 : vector<2x8x8xf32>
    %75 = arith.truncf %74 : vector<2x8x8xf32> to vector<2x8x8xbf16>
    "tpu.trace_start"() <{level = 10 : i32, message = "bqk,bkd->bqd"}> : () -> ()
    %cst_33 = arith.constant dense<0.000000e+00> : vector<2x8x8xf32>
    %76 = tpu.matmul %75, %60, %cst_33 {dimension_numbers = #tpu.dot_dimension_numbers<[2], [1], [1], [2], [0, 0, 0, 1, 1, 2], [0], [0]>} : vector<2x8x8xbf16>, vector<2x8x8xbf16>, vector<2x8x8xf32> -> vector<2x8x8xf32>
    "tpu.trace_stop"() : () -> ()
    %77 = vector.shape_cast %76 : vector<2x8x8xf32> to vector<16x8xf32>
    %78 = arith.truncf %77 : vector<16x8xf32> to vector<16x8xbf16>
    %79 = vector.extract_strided_slice %53 {offsets = [0, 0], sizes = [8, 32], strides = [1, 1]} : vector<32x32xbf16> to vector<8x32xbf16>
    %cst_34 = arith.constant dense<0.000000e+00> : vector<16x32xf32>
    %80 = tpu.matmul %78, %79, %cst_34 {dimension_numbers = #tpu.dot_dimension_numbers<[1], [0], [0], [1], [0, 0, 1, 1], [], []>} : vector<16x8xbf16>, vector<8x32xbf16>, vector<16x32xf32> -> vector<16x32xf32>
    %81 = arith.addf %54, %80 : vector<16x32xf32>
    %82 = vector.extract_strided_slice %51 {offsets = [0, 8], sizes = [16, 8], strides = [1, 1]} : vector<16x96xbf16> to vector<16x8xbf16>
    %83 = vector.shape_cast %82 : vector<16x8xbf16> to vector<2x8x8xbf16>
    %84 = vector.extract_strided_slice %51 {offsets = [0, 40], sizes = [16, 8], strides = [1, 1]} : vector<16x96xbf16> to vector<16x8xbf16>
    %85 = vector.shape_cast %84 : vector<16x8xbf16> to vector<2x8x8xbf16>
    %86 = vector.extract_strided_slice %51 {offsets = [0, 72], sizes = [16, 8], strides = [1, 1]} : vector<16x96xbf16> to vector<16x8xbf16>
    %87 = vector.shape_cast %86 : vector<16x8xbf16> to vector<2x8x8xbf16>
    "tpu.trace_start"() <{level = 10 : i32, message = "bqd,bkd->bqk"}> : () -> ()
    %cst_35 = arith.constant dense<0.000000e+00> : vector<2x8x8xf32>
    %88 = tpu.matmul %83, %85, %cst_35 {dimension_numbers = #tpu.dot_dimension_numbers<[2], [2], [1], [1], [0, 0, 0, 1, 1, 1], [0], [0]>} : vector<2x8x8xbf16>, vector<2x8x8xbf16>, vector<2x8x8xf32> -> vector<2x8x8xf32>
    "tpu.trace_stop"() : () -> ()
    %cst_36 = arith.constant 0.353553385 : f32
    %89 = vector.broadcast %cst_36 : f32 to vector<2x8x8xf32>
    %90 = arith.mulf %88, %89 : vector<2x8x8xf32>
    %91 = arith.addf %90, %16 : vector<2x8x8xf32>
    %cst_37 = arith.constant dense<0xFF800000> : vector<2x8xf32>
    %92 = vector.multi_reduction <maximumf>, %91, %cst_37 [2] : vector<2x8x8xf32> to vector<2x8xf32>
    %93 = vector.shape_cast %92 : vector<2x8xf32> to vector<2x8x1xf32>
    %94 = vector.broadcast %93 : vector<2x8x1xf32> to vector<2x8x8xf32>
    %95 = arith.subf %91, %94 : vector<2x8x8xf32>
    %96 = math.exp %95 : vector<2x8x8xf32>
    %cst_38 = arith.constant dense<0.000000e+00> : vector<2x8xf32>
    %97 = vector.multi_reduction <add>, %96, %cst_38 [2] : vector<2x8x8xf32> to vector<2x8xf32>
    %98 = vector.shape_cast %97 : vector<2x8xf32> to vector<2x8x1xf32>
    %99 = tpu.reciprocal %98 {approx = true} : vector<2x8x1xf32> -> vector<2x8x1xf32>
    %100 = vector.broadcast %99 : vector<2x8x1xf32> to vector<2x8x8xf32>
    %101 = arith.mulf %96, %100 : vector<2x8x8xf32>
    %102 = arith.truncf %101 : vector<2x8x8xf32> to vector<2x8x8xbf16>
    "tpu.trace_start"() <{level = 10 : i32, message = "bqk,bkd->bqd"}> : () -> ()
    %cst_39 = arith.constant dense<0.000000e+00> : vector<2x8x8xf32>
    %103 = tpu.matmul %102, %87, %cst_39 {dimension_numbers = #tpu.dot_dimension_numbers<[2], [1], [1], [2], [0, 0, 0, 1, 1, 2], [0], [0]>} : vector<2x8x8xbf16>, vector<2x8x8xbf16>, vector<2x8x8xf32> -> vector<2x8x8xf32>
    "tpu.trace_stop"() : () -> ()
    %104 = vector.shape_cast %103 : vector<2x8x8xf32> to vector<16x8xf32>
    %105 = arith.truncf %104 : vector<16x8xf32> to vector<16x8xbf16>
    %106 = vector.extract_strided_slice %53 {offsets = [8, 0], sizes = [8, 32], strides = [1, 1]} : vector<32x32xbf16> to vector<8x32xbf16>
    %cst_40 = arith.constant dense<0.000000e+00> : vector<16x32xf32>
    %107 = tpu.matmul %105, %106, %cst_40 {dimension_numbers = #tpu.dot_dimension_numbers<[1], [0], [0], [1], [0, 0, 1, 1], [], []>} : vector<16x8xbf16>, vector<8x32xbf16>, vector<16x32xf32> -> vector<16x32xf32>
    %108 = arith.addf %81, %107 : vector<16x32xf32>
    %109 = vector.extract_strided_slice %51 {offsets = [0, 16], sizes = [16, 8], strides = [1, 1]} : vector<16x96xbf16> to vector<16x8xbf16>
    %110 = vector.shape_cast %109 : vector<16x8xbf16> to vector<2x8x8xbf16>
    %111 = vector.extract_strided_slice %51 {offsets = [0, 48], sizes = [16, 8], strides = [1, 1]} : vector<16x96xbf16> to vector<16x8xbf16>
    %112 = vector.shape_cast %111 : vector<16x8xbf16> to vector<2x8x8xbf16>
    %113 = vector.extract_strided_slice %51 {offsets = [0, 80], sizes = [16, 8], strides = [1, 1]} : vector<16x96xbf16> to vector<16x8xbf16>
    %114 = vector.shape_cast %113 : vector<16x8xbf16> to vector<2x8x8xbf16>
    "tpu.trace_start"() <{level = 10 : i32, message = "bqd,bkd->bqk"}> : () -> ()
    %cst_41 = arith.constant dense<0.000000e+00> : vector<2x8x8xf32>
    %115 = tpu.matmul %110, %112, %cst_41 {dimension_numbers = #tpu.dot_dimension_numbers<[2], [2], [1], [1], [0, 0, 0, 1, 1, 1], [0], [0]>} : vector<2x8x8xbf16>, vector<2x8x8xbf16>, vector<2x8x8xf32> -> vector<2x8x8xf32>
    "tpu.trace_stop"() : () -> ()
    %cst_42 = arith.constant 0.353553385 : f32
    %116 = vector.broadcast %cst_42 : f32 to vector<2x8x8xf32>
    %117 = arith.mulf %115, %116 : vector<2x8x8xf32>
    %118 = arith.addf %117, %16 : vector<2x8x8xf32>
    %cst_43 = arith.constant dense<0xFF800000> : vector<2x8xf32>
    %119 = vector.multi_reduction <maximumf>, %118, %cst_43 [2] : vector<2x8x8xf32> to vector<2x8xf32>
    %120 = vector.shape_cast %119 : vector<2x8xf32> to vector<2x8x1xf32>
    %121 = vector.broadcast %120 : vector<2x8x1xf32> to vector<2x8x8xf32>
    %122 = arith.subf %118, %121 : vector<2x8x8xf32>
    %123 = math.exp %122 : vector<2x8x8xf32>
    %cst_44 = arith.constant dense<0.000000e+00> : vector<2x8xf32>
    %124 = vector.multi_reduction <add>, %123, %cst_44 [2] : vector<2x8x8xf32> to vector<2x8xf32>
    %125 = vector.shape_cast %124 : vector<2x8xf32> to vector<2x8x1xf32>
    %126 = tpu.reciprocal %125 {approx = true} : vector<2x8x1xf32> -> vector<2x8x1xf32>
    %127 = vector.broadcast %126 : vector<2x8x1xf32> to vector<2x8x8xf32>
    %128 = arith.mulf %123, %127 : vector<2x8x8xf32>
    %129 = arith.truncf %128 : vector<2x8x8xf32> to vector<2x8x8xbf16>
    "tpu.trace_start"() <{level = 10 : i32, message = "bqk,bkd->bqd"}> : () -> ()
    %cst_45 = arith.constant dense<0.000000e+00> : vector<2x8x8xf32>
    %130 = tpu.matmul %129, %114, %cst_45 {dimension_numbers = #tpu.dot_dimension_numbers<[2], [1], [1], [2], [0, 0, 0, 1, 1, 2], [0], [0]>} : vector<2x8x8xbf16>, vector<2x8x8xbf16>, vector<2x8x8xf32> -> vector<2x8x8xf32>
    "tpu.trace_stop"() : () -> ()
    %131 = vector.shape_cast %130 : vector<2x8x8xf32> to vector<16x8xf32>
    %132 = arith.truncf %131 : vector<16x8xf32> to vector<16x8xbf16>
    %133 = vector.extract_strided_slice %53 {offsets = [16, 0], sizes = [8, 32], strides = [1, 1]} : vector<32x32xbf16> to vector<8x32xbf16>
    %cst_46 = arith.constant dense<0.000000e+00> : vector<16x32xf32>
    %134 = tpu.matmul %132, %133, %cst_46 {dimension_numbers = #tpu.dot_dimension_numbers<[1], [0], [0], [1], [0, 0, 1, 1], [], []>} : vector<16x8xbf16>, vector<8x32xbf16>, vector<16x32xf32> -> vector<16x32xf32>
    %135 = arith.addf %108, %134 : vector<16x32xf32>
    %136 = vector.extract_strided_slice %51 {offsets = [0, 24], sizes = [16, 8], strides = [1, 1]} : vector<16x96xbf16> to vector<16x8xbf16>
    %137 = vector.shape_cast %136 : vector<16x8xbf16> to vector<2x8x8xbf16>
    %138 = vector.extract_strided_slice %51 {offsets = [0, 56], sizes = [16, 8], strides = [1, 1]} : vector<16x96xbf16> to vector<16x8xbf16>
    %139 = vector.shape_cast %138 : vector<16x8xbf16> to vector<2x8x8xbf16>
    %140 = vector.extract_strided_slice %51 {offsets = [0, 88], sizes = [16, 8], strides = [1, 1]} : vector<16x96xbf16> to vector<16x8xbf16>
    %141 = vector.shape_cast %140 : vector<16x8xbf16> to vector<2x8x8xbf16>
    "tpu.trace_start"() <{level = 10 : i32, message = "bqd,bkd->bqk"}> : () -> ()
    %cst_47 = arith.constant dense<0.000000e+00> : vector<2x8x8xf32>
    %142 = tpu.matmul %137, %139, %cst_47 {dimension_numbers = #tpu.dot_dimension_numbers<[2], [2], [1], [1], [0, 0, 0, 1, 1, 1], [0], [0]>} : vector<2x8x8xbf16>, vector<2x8x8xbf16>, vector<2x8x8xf32> -> vector<2x8x8xf32>
    "tpu.trace_stop"() : () -> ()
    %cst_48 = arith.constant 0.353553385 : f32
    %143 = vector.broadcast %cst_48 : f32 to vector<2x8x8xf32>
    %144 = arith.mulf %142, %143 : vector<2x8x8xf32>
    %145 = arith.addf %144, %16 : vector<2x8x8xf32>
    %cst_49 = arith.constant dense<0xFF800000> : vector<2x8xf32>
    %146 = vector.multi_reduction <maximumf>, %145, %cst_49 [2] : vector<2x8x8xf32> to vector<2x8xf32>
    %147 = vector.shape_cast %146 : vector<2x8xf32> to vector<2x8x1xf32>
    %148 = vector.broadcast %147 : vector<2x8x1xf32> to vector<2x8x8xf32>
    %149 = arith.subf %145, %148 : vector<2x8x8xf32>
    %150 = math.exp %149 : vector<2x8x8xf32>
    %cst_50 = arith.constant dense<0.000000e+00> : vector<2x8xf32>
    %151 = vector.multi_reduction <add>, %150, %cst_50 [2] : vector<2x8x8xf32> to vector<2x8xf32>
    %152 = vector.shape_cast %151 : vector<2x8xf32> to vector<2x8x1xf32>
    %153 = tpu.reciprocal %152 {approx = true} : vector<2x8x1xf32> -> vector<2x8x1xf32>
    %154 = vector.broadcast %153 : vector<2x8x1xf32> to vector<2x8x8xf32>
    %155 = arith.mulf %150, %154 : vector<2x8x8xf32>
    %156 = arith.truncf %155 : vector<2x8x8xf32> to vector<2x8x8xbf16>
    "tpu.trace_start"() <{level = 10 : i32, message = "bqk,bkd->bqd"}> : () -> ()
    %cst_51 = arith.constant dense<0.000000e+00> : vector<2x8x8xf32>
    %157 = tpu.matmul %156, %141, %cst_51 {dimension_numbers = #tpu.dot_dimension_numbers<[2], [1], [1], [2], [0, 0, 0, 1, 1, 2], [0], [0]>} : vector<2x8x8xbf16>, vector<2x8x8xbf16>, vector<2x8x8xf32> -> vector<2x8x8xf32>
    "tpu.trace_stop"() : () -> ()
    %158 = vector.shape_cast %157 : vector<2x8x8xf32> to vector<16x8xf32>
    %159 = arith.truncf %158 : vector<16x8xf32> to vector<16x8xbf16>
    %160 = vector.extract_strided_slice %53 {offsets = [24, 0], sizes = [8, 32], strides = [1, 1]} : vector<32x32xbf16> to vector<8x32xbf16>
    %cst_52 = arith.constant dense<0.000000e+00> : vector<16x32xf32>
    %161 = tpu.matmul %159, %160, %cst_52 {dimension_numbers = #tpu.dot_dimension_numbers<[1], [0], [0], [1], [0, 0, 1, 1], [], []>} : vector<16x8xbf16>, vector<8x32xbf16>, vector<16x32xf32> -> vector<16x32xf32>
    %162 = arith.addf %135, %161 : vector<16x32xf32>
    %163 = arith.addf %3, %162 : vector<16x32xf32>
    %c0_53 = arith.constant 0 : index
    %c0_54 = arith.constant 0 : index
    %c0_55 = arith.constant 0 : index
    %164 = vector.load %arg10[%c0_53, %c0_54, %c0_55] : memref<1x1x32xf32, #tpu.memory_space<vmem>>, vector<1x1x32xf32>
    %165 = vector.shape_cast %164 : vector<1x1x32xf32> to vector<1x32xf32>
    %166 = vector.broadcast %165 : vector<1x32xf32> to vector<16x32xf32>
    %167 = arith.addf %163, %166 : vector<16x32xf32>
    %c0_56 = arith.constant 0 : index
    %c0_57 = arith.constant 0 : index
    %c0_58 = arith.constant 0 : index
    %168 = vector.load %arg11[%c0_56, %c0_57, %c0_58] : memref<1x1x32xf32, #tpu.memory_space<vmem>>, vector<1x1x32xf32>
    %169 = vector.shape_cast %168 : vector<1x1x32xf32> to vector<1x32xf32>
    %c0_59 = arith.constant 0 : index
    %c0_60 = arith.constant 0 : index
    %c0_61 = arith.constant 0 : index
    %170 = vector.load %arg12[%c0_59, %c0_60, %c0_61] : memref<1x1x32xf32, #tpu.memory_space<vmem>>, vector<1x1x32xf32>
    %171 = vector.shape_cast %170 : vector<1x1x32xf32> to vector<1x32xf32>
    %cst_62 = arith.constant dense<0.000000e+00> : vector<16xf32>
    %172 = vector.multi_reduction <add>, %167, %cst_62 [1] : vector<16x32xf32> to vector<16xf32>
    %173 = vector.shape_cast %172 : vector<16xf32> to vector<16x1xf32>
    %cst_63 = arith.constant 3.200000e+01 : f32
    %174 = vector.broadcast %cst_63 : f32 to vector<16x1xf32>
    %175 = arith.divf %173, %174 : vector<16x1xf32>
    %176 = vector.broadcast %175 : vector<16x1xf32> to vector<16x32xf32>
    %177 = arith.subf %167, %176 : vector<16x32xf32>
    %178 = arith.mulf %177, %177 : vector<16x32xf32>
    %cst_64 = arith.constant dense<0.000000e+00> : vector<16xf32>
    %179 = vector.multi_reduction <add>, %178, %cst_64 [1] : vector<16x32xf32> to vector<16xf32>
    %180 = vector.shape_cast %179 : vector<16xf32> to vector<16x1xf32>
    %cst_65 = arith.constant 3.200000e+01 : f32
    %181 = vector.broadcast %cst_65 : f32 to vector<16x1xf32>
    %182 = arith.divf %180, %181 : vector<16x1xf32>
    %183 = vector.broadcast %175 : vector<16x1xf32> to vector<16x32xf32>
    %184 = arith.subf %167, %183 : vector<16x32xf32>
    %cst_66 = arith.constant 9.99999974E-6 : f32
    %185 = vector.broadcast %cst_66 : f32 to vector<16x1xf32>
    %186 = arith.addf %182, %185 : vector<16x1xf32>
    %187 = math.rsqrt %186 : vector<16x1xf32>
    %188 = vector.broadcast %187 : vector<16x1xf32> to vector<16x32xf32>
    %189 = arith.mulf %184, %188 : vector<16x32xf32>
    %190 = vector.broadcast %169 : vector<1x32xf32> to vector<16x32xf32>
    %191 = arith.mulf %189, %190 : vector<16x32xf32>
    %192 = vector.broadcast %171 : vector<1x32xf32> to vector<16x32xf32>
    %193 = arith.addf %191, %192 : vector<16x32xf32>
    %194 = arith.truncf %193 : vector<16x32xf32> to vector<16x32xbf16>
    %c0_67 = arith.constant 0 : index
    %c0_68 = arith.constant 0 : index
    %c0_69 = arith.constant 0 : index
    %195 = vector.load %arg13[%c0_67, %c0_68, %c0_69] : memref<1x32x128xbf16, #tpu.memory_space<vmem>>, vector<1x32x128xbf16>
    %196 = vector.shape_cast %195 : vector<1x32x128xbf16> to vector<32x128xbf16>
    %cst_70 = arith.constant dense<0.000000e+00> : vector<16x128xf32>
    %197 = tpu.matmul %194, %196, %cst_70 {dimension_numbers = #tpu.dot_dimension_numbers<[1], [0], [0], [1], [0, 0, 1, 1], [], []>} : vector<16x32xbf16>, vector<32x128xbf16>, vector<16x128xf32> -> vector<16x128xf32>
    %c0_71 = arith.constant 0 : index
    %c0_72 = arith.constant 0 : index
    %c0_73 = arith.constant 0 : index
    %198 = vector.load %arg14[%c0_71, %c0_72, %c0_73] : memref<1x1x128xf32, #tpu.memory_space<vmem>>, vector<1x1x128xf32>
    %199 = vector.shape_cast %198 : vector<1x1x128xf32> to vector<1x128xf32>
    %200 = vector.broadcast %199 : vector<1x128xf32> to vector<16x128xf32>
    %201 = arith.addf %197, %200 : vector<16x128xf32>
    %cst_74 = arith.constant 5.000000e-01 : f32
    %202 = vector.broadcast %cst_74 : f32 to vector<16x128xf32>
    %203 = arith.mulf %202, %201 : vector<16x128xf32>
    %cst_75 = arith.constant 4.471500e-02 : f32
    %204 = vector.broadcast %cst_75 : f32 to vector<16x128xf32>
    %205 = arith.mulf %204, %201 : vector<16x128xf32>
    %206 = arith.mulf %205, %201 : vector<16x128xf32>
    %207 = arith.mulf %206, %201 : vector<16x128xf32>
    %208 = arith.addf %201, %207 : vector<16x128xf32>
    %cst_76 = arith.constant 0.797884583 : f32
    %209 = vector.broadcast %cst_76 : f32 to vector<16x128xf32>
    %210 = arith.mulf %209, %208 : vector<16x128xf32>
    %211 = math.tanh %210 : vector<16x128xf32>
    %cst_77 = arith.constant 1.000000e+00 : f32
    %212 = vector.broadcast %cst_77 : f32 to vector<16x128xf32>
    %213 = arith.addf %212, %211 : vector<16x128xf32>
    %214 = arith.mulf %203, %213 : vector<16x128xf32>
    %215 = arith.truncf %214 : vector<16x128xf32> to vector<16x128xbf16>
    %c0_78 = arith.constant 0 : index
    %c0_79 = arith.constant 0 : index
    %c0_80 = arith.constant 0 : index
    %216 = vector.load %arg15[%c0_78, %c0_79, %c0_80] : memref<1x128x32xbf16, #tpu.memory_space<vmem>>, vector<1x128x32xbf16>
    %217 = vector.shape_cast %216 : vector<1x128x32xbf16> to vector<128x32xbf16>
    %cst_81 = arith.constant dense<0.000000e+00> : vector<16x32xf32>
    %218 = tpu.matmul %215, %217, %cst_81 {dimension_numbers = #tpu.dot_dimension_numbers<[1], [0], [0], [1], [0, 0, 1, 1], [], []>} : vector<16x128xbf16>, vector<128x32xbf16>, vector<16x32xf32> -> vector<16x32xf32>
    %c0_82 = arith.constant 0 : index
    %c0_83 = arith.constant 0 : index
    %c0_84 = arith.constant 0 : index
    %219 = vector.load %arg16[%c0_82, %c0_83, %c0_84] : memref<1x1x32xf32, #tpu.memory_space<vmem>>, vector<1x1x32xf32>
    %220 = vector.shape_cast %219 : vector<1x1x32xf32> to vector<1x32xf32>
    %221 = vector.broadcast %220 : vector<1x32xf32> to vector<16x32xf32>
    %222 = arith.addf %218, %221 : vector<16x32xf32>
    %223 = arith.addf %167, %222 : vector<16x32xf32>
    %c0_85 = arith.constant 0 : index
    %c0_86 = arith.constant 0 : index
    %224 = vector.load %arg22[%c0_85, %c0_86] : memref<16x32xf32, #tpu.memory_space<vmem>>, vector<16x32xf32>
    tpu.vector_store %arg22[%c0_85, %c0_86], %223 {strides = array<i32>} : memref<16x32xf32, #tpu.memory_space<vmem>>, vector<16x32xf32>,
    %c1_i32 = arith.constant 1 : i32
    %225 = arith.cmpi eq, %arg1, %c1_i32 : i32
    %226 = arith.extui %225 : i1 to i32
    %c0_i32_87 = arith.constant 0 : i32
    %227 = arith.cmpi ne, %226, %c0_i32_87 : i32
    scf.if %227 {
      %c2_i32 = arith.constant 2 : i32
      %228 = arith.muli %arg0, %c2_i32 : i32
      %c0_i32_88 = arith.constant 0 : i32
      %229 = arith.addi %228, %c0_i32_88 : i32
      %230 = arith.index_cast %229 : i32 to index
      %231 = memref.load %arg2[%230] : memref<2xi32, #tpu.memory_space<smem>>
      %c0_i32_89 = arith.constant 0 : i32
      %232 = arith.addi %c0_i32_89, %231 : i32
      %233 = arith.index_cast %232 : i32 to index
      %c0_90 = arith.constant 0 : index
      %234 = vector.load %arg22[%233, %c0_90] : memref<16x32xf32, #tpu.memory_space<vmem>>, vector<1x32xf32>
      %c2_i32_91 = arith.constant 2 : i32
      %235 = arith.muli %arg0, %c2_i32_91 : i32
      %c1_i32_92 = arith.constant 1 : i32
      %236 = arith.addi %235, %c1_i32_92 : i32
      %237 = arith.index_cast %236 : i32 to index
      %238 = memref.load %arg2[%237] : memref<2xi32, #tpu.memory_space<smem>>
      %c8_i32 = arith.constant 8 : i32
      %239 = arith.addi %c8_i32, %238 : i32
      %240 = arith.index_cast %239 : i32 to index
      %c0_93 = arith.constant 0 : index
      %241 = vector.load %arg22[%240, %c0_93] : memref<16x32xf32, #tpu.memory_space<vmem>>, vector<1x32xf32>
      %242 = tpu.concatenate %234, %241 in 0 : vector<1x32xf32>, vector<1x32xf32> -> vector<2x32xf32>
      %c0_94 = arith.constant 0 : index
      %c0_95 = arith.constant 0 : index
      %243 = vector.load %arg17[%c0_94, %c0_95] : memref<1x32xf32, #tpu.memory_space<vmem>>, vector<1x32xf32>
      %c0_96 = arith.constant 0 : index
      %c0_97 = arith.constant 0 : index
      %244 = vector.load %arg18[%c0_96, %c0_97] : memref<1x32xf32, #tpu.memory_space<vmem>>, vector<1x32xf32>
      %cst_98 = arith.constant dense<0.000000e+00> : vector<2xf32>
      %245 = vector.multi_reduction <add>, %242, %cst_98 [1] : vector<2x32xf32> to vector<2xf32>
      %246 = vector.shape_cast %245 : vector<2xf32> to vector<2x1xf32>
      %cst_99 = arith.constant 3.200000e+01 : f32
      %247 = vector.broadcast %cst_99 : f32 to vector<2x1xf32>
      %248 = arith.divf %246, %247 : vector<2x1xf32>
      %249 = vector.broadcast %248 : vector<2x1xf32> to vector<2x32xf32>
      %250 = arith.subf %242, %249 : vector<2x32xf32>
      %251 = arith.mulf %250, %250 : vector<2x32xf32>
      %cst_100 = arith.constant dense<0.000000e+00> : vector<2xf32>
      %252 = vector.multi_reduction <add>, %251, %cst_100 [1] : vector<2x32xf32> to vector<2xf32>
      %253 = vector.shape_cast %252 : vector<2xf32> to vector<2x1xf32>
      %cst_101 = arith.constant 3.200000e+01 : f32
      %254 = vector.broadcast %cst_101 : f32 to vector<2x1xf32>
      %255 = arith.divf %253, %254 : vector<2x1xf32>
      %256 = vector.broadcast %248 : vector<2x1xf32> to vector<2x32xf32>
      %257 = arith.subf %242, %256 : vector<2x32xf32>
      %cst_102 = arith.constant 9.99999974E-6 : f32
      %258 = vector.broadcast %cst_102 : f32 to vector<2x1xf32>
      %259 = arith.addf %255, %258 : vector<2x1xf32>
      %260 = math.rsqrt %259 : vector<2x1xf32>
      %261 = vector.broadcast %260 : vector<2x1xf32> to vector<2x32xf32>
      %262 = arith.mulf %257, %261 : vector<2x32xf32>
      %263 = vector.broadcast %243 : vector<1x32xf32> to vector<2x32xf32>
      %264 = arith.mulf %262, %263 : vector<2x32xf32>
      %265 = vector.broadcast %244 : vector<1x32xf32> to vector<2x32xf32>
      %266 = arith.addf %264, %265 : vector<2x32xf32>
      %267 = arith.truncf %266 : vector<2x32xf32> to vector<2x32xbf16>
      %c0_103 = arith.constant 0 : index
      %c0_104 = arith.constant 0 : index
      %268 = vector.load %arg19[%c0_103, %c0_104] : memref<32x16xbf16, #tpu.memory_space<vmem>>, vector<32x16xbf16>
      %cst_105 = arith.constant dense<0.000000e+00> : vector<2x16xf32>
      %269 = tpu.matmul %267, %268, %cst_105 {dimension_numbers = #tpu.dot_dimension_numbers<[1], [0], [0], [1], [0, 0, 1, 1], [], []>} : vector<2x32xbf16>, vector<32x16xbf16>, vector<2x16xf32> -> vector<2x16xf32>
      %c0_106 = arith.constant 0 : index
      %c0_107 = arith.constant 0 : index
      %270 = vector.load %arg20[%c0_106, %c0_107] : memref<1x16xf32, #tpu.memory_space<vmem>>, vector<1x16xf32>
      %271 = vector.broadcast %270 : vector<1x16xf32> to vector<2x16xf32>
      %272 = arith.addf %269, %271 : vector<2x16xf32>
      %273 = arith.mulf %272, %272 : vector<2x16xf32>
      %cst_108 = arith.constant dense<0.000000e+00> : vector<2xf32>
      %274 = vector.multi_reduction <add>, %273, %cst_108 [1] : vector<2x16xf32> to vector<2xf32>
      %275 = vector.shape_cast %274 : vector<2xf32> to vector<2x1xf32>
      %cst_109 = arith.constant 1.000000e-24 : f32
      %276 = vector.broadcast %cst_109 : f32 to vector<2x1xf32>
      %277 = arith.maximumf %275, %276 : vector<2x1xf32>
      %278 = math.rsqrt %277 : vector<2x1xf32>
      %279 = vector.broadcast %278 : vector<2x1xf32> to vector<2x16xf32>
      %280 = arith.mulf %272, %279 : vector<2x16xf32>
      %281 = vector.shape_cast %280 : vector<2x16xf32> to vector<2x1x16xf32>
      %c0_110 = arith.constant 0 : index
      %c0_111 = arith.constant 0 : index
      %c0_112 = arith.constant 0 : index
      %282 = vector.load %arg21[%c0_110, %c0_111, %c0_112] : memref<2x1x16xf32, #tpu.memory_space<vmem>>, vector<2x1x16xf32>
      tpu.vector_store %arg21[%c0_110, %c0_111, %c0_112], %281 {strides = array<i32>} : memref<2x1x16xf32, #tpu.memory_space<vmem>>, vector<2x1x16xf32>,
    } else {
    }
    return
  }
  func.func @transform_0(%arg0: i32, %arg1: i32, %arg2: memref<2xi32, #tpu.memory_space<smem>>) -> (i32, i32, i32) {
    %c0_i32 = arith.constant 0 : i32
    %c0_i32_0 = arith.constant 0 : i32
    %c0_i32_1 = arith.constant 0 : i32
    return %arg0, %c0_i32, %c0_i32_0 : i32, i32, i32
  }
  func.func @transform_1(%arg0: i32, %arg1: i32, %arg2: memref<2xi32, #tpu.memory_space<smem>>) -> (i32, i32, i32) {
    %c0_i32 = arith.constant 0 : i32
    %c0_i32_0 = arith.constant 0 : i32
    %c0_i32_1 = arith.constant 0 : i32
    return %arg0, %c0_i32, %c0_i32_0 : i32, i32, i32
  }
  func.func @transform_2(%arg0: i32, %arg1: i32, %arg2: memref<2xi32, #tpu.memory_space<smem>>) -> (i32, i32, i32) {
    %c0_i32 = arith.constant 0 : i32
    %c0_i32_0 = arith.constant 0 : i32
    %c0_i32_1 = arith.constant 0 : i32
    return %arg1, %c0_i32, %c0_i32_0 : i32, i32, i32
  }
  func.func @transform_3(%arg0: i32, %arg1: i32, %arg2: memref<2xi32, #tpu.memory_space<smem>>) -> (i32, i32, i32) {
    %c0_i32 = arith.constant 0 : i32
    %c0_i32_0 = arith.constant 0 : i32
    %c0_i32_1 = arith.constant 0 : i32
    return %arg1, %c0_i32, %c0_i32_0 : i32, i32, i32
  }
  func.func @transform_4(%arg0: i32, %arg1: i32, %arg2: memref<2xi32, #tpu.memory_space<smem>>) -> (i32, i32, i32) {
    %c0_i32 = arith.constant 0 : i32
    %c0_i32_0 = arith.constant 0 : i32
    %c0_i32_1 = arith.constant 0 : i32
    return %arg1, %c0_i32, %c0_i32_0 : i32, i32, i32
  }
  func.func @transform_5(%arg0: i32, %arg1: i32, %arg2: memref<2xi32, #tpu.memory_space<smem>>) -> (i32, i32, i32) {
    %c0_i32 = arith.constant 0 : i32
    %c0_i32_0 = arith.constant 0 : i32
    %c0_i32_1 = arith.constant 0 : i32
    return %arg1, %c0_i32, %c0_i32_0 : i32, i32, i32
  }
  func.func @transform_6(%arg0: i32, %arg1: i32, %arg2: memref<2xi32, #tpu.memory_space<smem>>) -> (i32, i32, i32) {
    %c0_i32 = arith.constant 0 : i32
    %c0_i32_0 = arith.constant 0 : i32
    %c0_i32_1 = arith.constant 0 : i32
    return %arg1, %c0_i32, %c0_i32_0 : i32, i32, i32
  }
  func.func @transform_7(%arg0: i32, %arg1: i32, %arg2: memref<2xi32, #tpu.memory_space<smem>>) -> (i32, i32, i32) {
    %c0_i32 = arith.constant 0 : i32
    %c0_i32_0 = arith.constant 0 : i32
    %c0_i32_1 = arith.constant 0 : i32
    return %arg1, %c0_i32, %c0_i32_0 : i32, i32, i32
  }
  func.func @transform_8(%arg0: i32, %arg1: i32, %arg2: memref<2xi32, #tpu.memory_space<smem>>) -> (i32, i32, i32) {
    %c0_i32 = arith.constant 0 : i32
    %c0_i32_0 = arith.constant 0 : i32
    %c0_i32_1 = arith.constant 0 : i32
    return %arg1, %c0_i32, %c0_i32_0 : i32, i32, i32
  }
  func.func @transform_9(%arg0: i32, %arg1: i32, %arg2: memref<2xi32, #tpu.memory_space<smem>>) -> (i32, i32, i32) {
    %c0_i32 = arith.constant 0 : i32
    %c0_i32_0 = arith.constant 0 : i32
    %c0_i32_1 = arith.constant 0 : i32
    return %arg1, %c0_i32, %c0_i32_0 : i32, i32, i32
  }
  func.func @transform_10(%arg0: i32, %arg1: i32, %arg2: memref<2xi32, #tpu.memory_space<smem>>) -> (i32, i32, i32) {
    %c0_i32 = arith.constant 0 : i32
    %c0_i32_0 = arith.constant 0 : i32
    %c0_i32_1 = arith.constant 0 : i32
    return %arg1, %c0_i32, %c0_i32_0 : i32, i32, i32
  }
  func.func @transform_11(%arg0: i32, %arg1: i32, %arg2: memref<2xi32, #tpu.memory_space<smem>>) -> (i32, i32, i32) {
    %c0_i32 = arith.constant 0 : i32
    %c0_i32_0 = arith.constant 0 : i32
    %c0_i32_1 = arith.constant 0 : i32
    return %arg1, %c0_i32, %c0_i32_0 : i32, i32, i32
  }
  func.func @transform_12(%arg0: i32, %arg1: i32, %arg2: memref<2xi32, #tpu.memory_space<smem>>) -> (i32, i32, i32) {
    %c0_i32 = arith.constant 0 : i32
    %c0_i32_0 = arith.constant 0 : i32
    %c0_i32_1 = arith.constant 0 : i32
    return %arg1, %c0_i32, %c0_i32_0 : i32, i32, i32
  }
  func.func @transform_13(%arg0: i32, %arg1: i32, %arg2: memref<2xi32, #tpu.memory_space<smem>>) -> (i32, i32, i32) {
    %c0_i32 = arith.constant 0 : i32
    %c0_i32_0 = arith.constant 0 : i32
    %c0_i32_1 = arith.constant 0 : i32
    return %arg1, %c0_i32, %c0_i32_0 : i32, i32, i32
  }
  func.func @transform_14(%arg0: i32, %arg1: i32, %arg2: memref<2xi32, #tpu.memory_space<smem>>) -> (i32, i32) {
    %c0_i32 = arith.constant 0 : i32
    %c0_i32_0 = arith.constant 0 : i32
    %c0_i32_1 = arith.constant 0 : i32
    return %c0_i32, %c0_i32_0 : i32, i32
  }
  func.func @transform_15(%arg0: i32, %arg1: i32, %arg2: memref<2xi32, #tpu.memory_space<smem>>) -> (i32, i32) {
    %c0_i32 = arith.constant 0 : i32
    %c0_i32_0 = arith.constant 0 : i32
    %c0_i32_1 = arith.constant 0 : i32
    return %c0_i32, %c0_i32_0 : i32, i32
  }
  func.func @transform_16(%arg0: i32, %arg1: i32, %arg2: memref<2xi32, #tpu.memory_space<smem>>) -> (i32, i32) {
    %c0_i32 = arith.constant 0 : i32
    %c0_i32_0 = arith.constant 0 : i32
    %c0_i32_1 = arith.constant 0 : i32
    return %c0_i32, %c0_i32_0 : i32, i32
  }
  func.func @transform_17(%arg0: i32, %arg1: i32, %arg2: memref<2xi32, #tpu.memory_space<smem>>) -> (i32, i32) {
    %c0_i32 = arith.constant 0 : i32
    %c0_i32_0 = arith.constant 0 : i32
    %c0_i32_1 = arith.constant 0 : i32
    return %c0_i32, %c0_i32_0 : i32, i32
  }
  func.func @transform_18(%arg0: i32, %arg1: i32, %arg2: memref<2xi32, #tpu.memory_space<smem>>) -> (i32, i32, i32) {
    %c0_i32 = arith.constant 0 : i32
    %c0_i32_0 = arith.constant 0 : i32
    %c0_i32_1 = arith.constant 0 : i32
    return %arg0, %c0_i32, %c0_i32_0 : i32, i32, i32
  }
}

</mosaic_0001>

<bundles_post_ra>
// kernel: gpt2_encoder_forward.1
= control target key start
LH: loop header
LB: loop body
LE: loop exit
PB: predicated region body
PF: predicated region fallthrough
CT: control target
= control target key end

     0   :  { %s3700_s0 = inlined_call_operand.vmem [shape: s32[2], index: 0, kind: input, shape index: {}]   ;;  %s3701_s1 = inlined_call_operand.vmem [shape: bf16[2,8,32], index: 1, kind: input, shape index: {}]   ;;  %s3702_s2 = inlined_call_operand.vmem [shape: f32[2,1,8], index: 2, kind: input, shape index: {}]   ;;  %s3703_s3 = inlined_call_operand.vmem [shape: f32[2,1,32], index: 3, kind: input, shape index: {}]   ;;  %s3704_s4 = inlined_call_operand.vmem [shape: f32[2,1,32], index: 4, kind: input, shape index: {}]   ;;  %s3705_s5 = inlined_call_operand.vmem [shape: bf16[2,32,96], index: 5, kind: input, shape index: {}]   ;;  %s3706_s6 = inlined_call_operand.vmem [shape: f32[2,1,96], index: 6, kind: input, shape index: {}]   ;;  %s3707_s7 = inlined_call_operand.vmem [shape: bf16[2,32,32], index: 7, kind: input, shape index: {}]   ;;  %s3708_s8 = inlined_call_operand.vmem [shape: f32[2,1,32], index: 8, kind: input, shape index: {}]   ;;  %s3709_s9 = inlined_call_operand.vmem [shape: f32[2,1,32], index: 9, kind: input, shape index: {}]   ;;  %s3710_s10 = inlined_call_operand.vmem [shape: f32[2,1,32], index: 10, kind: input, shape index: {}]   ;;  %s3711_s11 = inlined_call_operand.vmem [shape: bf16[2,32,128], index: 11, kind: input, shape index: {}]   ;;  %s3712_s12 = inlined_call_operand.vmem [shape: f32[2,1,128], index: 12, kind: input, shape index: {}]   ;;  %s3713_s13 = inlined_call_operand.vmem [shape: bf16[2,128,32], index: 13, kind: input, shape index: {}]   ;;  %s3714_s14 = inlined_call_operand.vmem [shape: f32[2,1,32], index: 14, kind: input, shape index: {}]   ;;  %s3715_s15 = inlined_call_operand.vmem [shape: f32[1,32], index: 15, kind: input, shape index: {}]   ;;  %s3716_s16 = inlined_call_operand.vmem [shape: f32[1,32], index: 16, kind: input, shape index: {}]   ;;  %s3717_s17 = inlined_call_operand.vmem [shape: bf16[32,16], index: 17, kind: input, shape index: {}]   ;;  %s3718_s18 = inlined_call_operand.vmem [shape: f32[1,16], index: 18, kind: input, shape index: {}]   ;;  %s3719_s19 = inlined_call_operand.hbm [shape: f32[2,1,16], index: 19, kind: output, shape index: {}]  }
   0x1   :  { %3723 = sst [smem:[#allocation12_spill]] %s3700_s0 }
   0x2   :  { %3724 = sst [smem:[#allocation13_spill]] %s3701_s1 }
   0x3   :  { %3725 = sst [smem:[#allocation14_spill]] %s3702_s2 }
   0x4   :  { %3726 = sst [smem:[#allocation15_spill]] %s3703_s3 }
   0x5   :  { %3727 = sst [smem:[#allocation16_spill]] %s3705_s5 }
   0x6   :  { %3728 = sst [smem:[#allocation17_spill]] %s3707_s7 }
   0x7   :  { %3729 = sst [smem:[#allocation18_spill]] %s3713_s13 }
   0x8   :  { %3730 = sst [smem:[#allocation19_spill]] %s3715_s15 }
   0x9   :  { %3731 = sst [smem:[#allocation20_spill]] %s3716_s16 }
   0xa   :  { %3732 = sst [smem:[#allocation21_spill]] %s3718_s18 }
   0xb   :  { %3733 = sst [smem:[#allocation22_spill]] %s3719_s19 }
   0xc   :  { %s3734_s20 = sld [smem:[#allocation12_spill]] }
  0x12   :  { %s24_s13 = sshll.u32 %s3734_s20, 4  ;;  %s25_s13 = int_to_ptr.vmem [resolvable:$true] %s24_s13 }
  0x13   :  { %s3082_s21 = scalar_lea.vmem %s25_s13, 16  ;;  %p3087_p1 = scmp.lt.s32.totalorder %s25_s13, %s25_s13 }
  0x14   :  { %p3083_p0 = scmp.ne.s32.totalorder %s25_s13, %s3082_s21  ;;  %p3088_p2 = scmp.lt.s32.totalorder %s3082_s21, %s3082_s21 }
  0x16   :  { %p3089_p3 = por %p3088_p2, %p3087_p1 }
  0x18   :  { %p3090_p4 = pnand %p3089_p3, %p3083_p0 }
  0x1a   :  { %3093 = shalt.err (!%p3090_p4)  }
  0x1b   :  { %s3148_s1 = smov [#allocation4]  }
  0x1c   :  { %27 = dma.vmem_to_smem %s25_s13, 16, %s3148_s1, [#allocation3] }
  0x1d   :  { %3130 = dma.done.wait [#allocation3], 16 }
  0x1e   :  { %3131 = vsyncadd [#allocation3], 4294967280 }
  0x1f   :  { %29 = sfence }
  0x20   :  { %30 = vsyncpa [#allocation6], 0  ;;  %s3273_s22 = smov 0   ;;  %s3275_s2 = smov 0  }
  0x21   :  { %s3277_s23 = smov 0  }
  0x22 LB: > { %3735 = sst [smem:[#allocation9_spill]] %s3142_s2  ;;  %s45_s24 = sadd.s32 1, %s3142_s2  ;;  %s3146_s23 = sphi %s3277_s23, %s36_s23   ;;  %s3142_s2 = sphi %s3275_s2, %s3758_s2   ;;  %s3138_s22 = sphi %s3273_s22, %s3757_s22  }
  0x23   : > { %3736 = sst [smem:[#allocation10_spill]] %s3146_s23  ;;  %p46_p5 = scmp.ge.s32.totalorder %s45_s24, 2 }
  0x24   : > { %p2669_p6 = scmp.ge.s32.totalorder %s3146_s23, 1  ;;  %p647_p7 = scmp.lt.s32.totalorder %s3146_s23, 3 }
  0x25   : > { %s3760_s24 = smov (%p46_p5, %s45_s24), 0 }
  0x26   : > { %3737 = sst [smem:[#allocation11_spill]] %s3760_s24  ;;  %p648_p8 = pnand %p2669_p6, %p647_p7 }
  0x27   : > { %p755_p9 = scmp.lt.s32.totalorder (!%p648_p8), %s3138_s22, 1  ;;  %s3739_s5 = sld [smem:[#allocation16_spill]] (!%p648_p8) }
  0x28   : > { %651 = sbr.rel (%p648_p8) target bundleno = 5014 (0x1396), region = 92  ;;  %s3740_s7 = sld [smem:[#allocation17_spill]] (!%p648_p8) }
  0x29   : > { %s3741_s29 = sld [smem:[#allocation18_spill]] (!%p648_p8)  ;;  %p2678_p10 = scmp.ne.s32.totalorder (!%p648_p8), %s3138_s22, 0 }
  0x2d   : > { %s3296_s25 = scalar_select %p755_p9, %s3138_s22, 1 }
  0x2e   : > { %s3742_s3 = sld [smem:[#allocation13_spill]] (!%p2678_p10) }
  0x2f   : > { %s2736_s20 = sshll.u32 %s3296_s25, 4  ;;  %s779_s18 = scalar_lea.vmem %s3709_s9, %s3296_s25 }
  0x30   : > { %s3314_s24 = scalar_lea.vmem %s3739_s5, %s2736_s20  ;;  %s3319_s23 = scalar_lea.vmem %s3740_s7, %s2736_s20 }
  0x31   : > { %s782_s13 = scalar_lea.vmem %s3710_s10, %s3296_s25  ;;  %s3336_s5 = scalar_lea.vmem %s3711_s11, %s2736_s20 }
  0x32   : > { %s790_s7 = scalar_lea.vmem %s3712_s12, %s3296_s25  ;;  %s2739_s16 = sshll.u32 %s3296_s25, 6 }
  0x33   : > { %s3346_s15 = scalar_lea.vmem %s3741_s29, %s2739_s16  ;;  %s798_s21 = scalar_lea.vmem %s3714_s14, %s3296_s25 }
  0x34   : > { %804 = sbr.rel (%p2678_p10) target bundleno = 61 (0x3d), region = 96 }
  0x39   : > { %v2743_v0 = vld [vmem:[%s3742_s3] sm:$0xff]   ;;  %vm809_vm0 = vcmask 261120  }
  0x3a   : > { %v2744_v1 = vunpack.c.l.bf16 %v2743_v0  ;;  %v2745_v2 = vunpack.c.h.bf16 %v2743_v0 }
  0x3c   : > { %810 = vst.msk [vmem:[#allocation2] sm:$0xff] %vm809_vm0, %v2744_v1  ;;  %811 = vst.msk [vmem:[#allocation2 + $0x8] sm:$0xff] %vm809_vm0, %v2745_v2 }
  0x3d PF: > { %vm843_vm1 = vcmask 261120   ;;  %v3020_v17 = vld [vmem:[%s3314_s24 + $0x8] sm:$0xff]   ;;  %v3149_v18 = vmov 0.0   ;;  %vm3150_vm2 = vmmov 0   ;;  %v3021_v19 = vld [vmem:[%s3314_s24] sm:$0xff]   ;;  %s3743_s29 = sld [smem:[#allocation15_spill]]  ;;  %s3745_s28 = scalar_lea.vmem %s3704_s4, %s3296_s25  ;;  %v814_v50 = vlaneseq }
  0x3e   : > { %2804 = vmatprep.subr.bf16.mxu1 %v3149_v18  ;;  %2808 = vmatprep.mubr.msk.bf16.mxu1 %vm3150_vm2, %v3149_v18  ;;  %v2680_v32 = vld [vmem:[%s3745_s28] ss:$0 sm:$0xff]  ;;  %s3746_s0 = scalar_lea.vmem %s3706_s6, %s3296_s25  ;;  %s3151_s1 = smov 96   ;;  %vm967_vm3 = vcmask 64512   ;;  %v3152_v54 = vmov 0   ;;  %vm1095_vm11 = vcmask 1043456  }
  0x3f   : > { %2805 = vmatpush3.bf16.msra.mxu1 %v3020_v17  ;;  %2830 = vmatprep.subr.bf16.mxu0 %v3149_v18  ;;  %v2681_v37 = vld [vmem:[%s3746_s0] ss:$0 sm:$0xff]  ;;  %s3747_s16 = sld [smem:[#allocation14_spill]]  ;;  %v3417_v52 = vshrl.u32 %v814_v50, 7  ;;  %v817_v57 = vand.u32 127, %v814_v50  ;;  %s3155_s19 = smov 88  }
  0x40   : > { %2806 = vmatprep.subr.bf16.mxu1 %v3149_v18  ;;  %2832 = vmatprep.mubr.msk.bf16.mxu0 %vm3150_vm2, %v3149_v18  ;;  %v3153_v62 = vmov -1e+09   ;;  %s3156_s2 = smov 120   ;;  %s3157_s28 = smov 56  }
  0x41   : > { %v829_v53 = vsub.s32 0, %v3417_v52  ;;  %vm818_vm6 = vcmp.le.s32.totalorder %v817_v57, %v3417_v52  ;;  %s3158_s27 = smov 80   ;;  %s3159_s30 = smov 112  }
  0x42   : > { %s3160_s0 = smov 48   ;;  %s3162_s20 = smov 104  }
  0x43   : > { %v3356_v3 = vld [vmem:[#allocation2] sm:$0xff]  ;;  %v3358_v4 = vld [vmem:[#allocation2 + $0x8] sm:$0xff]  ;;  %2807 = vmatpush3.bf16.msra.mxu1 %v3021_v19  ;;  %s3744_s26 = scalar_lea.vmem %s3743_s29, %s3296_s25  ;;  %s3163_s3 = smov 40  }
  0x44   : > { %v844_v5 = vsel %vm843_vm1, %v3356_v3, 0.0  ;;  %v847_v6 = vsel %vm843_vm1, %v3358_v4, 0.0  ;;  %2812 = vmatprep.subr.bf16.mxu1 %v3149_v18  ;;  %v2679_v28 = vld [vmem:[%s3744_s26] ss:$0 sm:$0xff]  ;;  %s3154_s26 = smov 64   ;;  %s3748_s29 = scalar_lea.vmem %s3708_s8, %s3296_s25 }
  0x45   : > { %845 = vadd.xlane.f32.xlu0 %v844_v5  ;;  %v819_v51 = vld [vmem:[%s3747_s16] sm:$0x1]  ;;  %v820_v56 = vld [vmem:[%s3747_s16 + $0x1] sm:$0x1]  ;;  %p2723_p11 = scmp.ne.s32.totalorder %s3138_s22, 1 }
  0x46   : > { %vm821_vm4 = vcmp.gt.f32.partialorder %v819_v51, 0.5  ;;  %vm822_vm5 = vcmp.gt.f32.partialorder %v820_v56, 0.5  ;;  %s2724_s25 = sld [smem:[#allocation4 + $0x1]] (!%p2723_p11) }
  0x47   : > { %v825_v55 = vsel %vm821_vm4, 1, %v3152_v54  ;;  %v826_v59 = vsel %vm822_vm5, 1, %v3152_v54 }
  0x48   : > { %v830_v58 = vrot.slane %v825_v55, %v829_v53  ;;  %v834_v60 = vrot.slane %v826_v59, %v829_v53 }
  0x49   : > { %848 = vadd.xlane.f32.xlu0 %v847_v6 }
  0x4a   : > { %vm835_vm7 = vcmp.eq.s32.totalorder %v830_v58, 1  ;;  %vm836_vm9 = vcmp.eq.s32.totalorder %v834_v60, 1 }
  0x4b   : > { %vm837_vm8 = vmand %vm818_vm6, %vm835_vm7 }
  0x4c   : > { %v3424_v63 = vsel %vm837_vm8, 0.0, %v3153_v62  ;;  %vm838_vm10 = vmand %vm818_vm6, %vm836_vm9 }
  0xce   : > { %v846_v7 = vpop.xlane.xlu0 %845 }
  0xcf   : > { %v851_v8 = vmul.f32 0.03125, %v846_v7 }
  0xd1   : > { %v853_v9 = vsub.f32 %v3356_v3, %v851_v8 }
  0xd2   : > { %v849_v10 = vpop.xlane.xlu0 %848 }
  0xd3   : > { %v852_v11 = vmul.f32 0.03125, %v849_v10  ;;  %v855_v12 = vmul.f32 %v853_v9, %v853_v9 }
  0xd5   : > { %v854_v13 = vsub.f32 %v3358_v4, %v852_v11  ;;  %v857_v14 = vsel %vm843_vm1, %v855_v12, 0.0 }
  0xd6   : > { %858 = vadd.xlane.f32.xlu1 %v857_v14 }
  0xd7   : > { %v856_v15 = vmul.f32 %v854_v13, %v854_v13 }
  0xd9   : > { %v860_v16 = vsel %vm843_vm1, %v856_v15, 0.0 }
  0xda   : > { %861 = vadd.xlane.f32.xlu1 %v860_v16 }
 0x15f   : > { %v859_v20 = vpop.xlane.xlu1 %858 }
 0x160   : > { %v863_v21 = vmul.f32 0.03125, %v859_v20 }
 0x162   : > { %v865_v22 = vadd.f32 1e-05, %v863_v21 }
 0x163   : > { %v862_v23 = vpop.xlane.xlu1 %861 }
 0x164   : > { %3032 = vrsqrt.f32 %v865_v22  ;;  %v864_v24 = vmul.f32 0.03125, %v862_v23 }
 0x166   : > { %v866_v25 = vadd.f32 1e-05, %v864_v24 }
 0x168   : > { %3034 = vrsqrt.f32 %v866_v25 }
 0x171   : > { %v3033_v26 = vpop.eup %3032 }
 0x172   : > { %v869_v27 = vmul.f32 %v3033_v26, %v853_v9  ;;  %v3428_v9 = vsel %vm838_vm10, 0.0, %v3153_v62 }
 0x174   : > { %v877_v31 = vmul.f32 %v2679_v28, %v869_v27 }
 0x175   : > { %v3035_v29 = vpop.eup %3034 }
 0x176   : > { %v870_v30 = vmul.f32 %v3035_v29, %v854_v13  ;;  %v885_v34 = vadd.f32 %v2680_v32, %v877_v31 }
 0x178   : > { %v878_v33 = vmul.f32 %v2679_v28, %v870_v30 }
 0x17a   : > { %v886_v35 = vadd.f32 %v2680_v32, %v878_v33 }
 0x17c   : > { %v887_v36 = vpack.c.bf16 %v886_v35, %v885_v34 }
 0x17e   : > { %2809 = vmatmul.mubr.msk.bf16.vlgmr.msra.gmra.mxu1 %vm843_vm1, %v887_v36 }
 0x17f   : > { %2814 = vmatprep.mubr.msk.bf16.mxu1 %vm3150_vm2, %v3149_v18 }
 0x23e   : > { %v948_v38 = vpop.f32.mrf.mxu1 }
 0x23f   : > { %v949_v39 = vadd.f32 %v2681_v37, %v948_v38 }
 0x240   : > { %v2810_v40 = vpop.f32.mrf.mxu1 }
 0x241   : > { %v3396_v41 = vpack.c.bf16 %v949_v39, %v949_v39 }
 0x242   : > { %v951_v42 = vpop.f32.mrf.mxu1 }
 0x243   : > { %v952_v43 = vadd.f32 %v2681_v37, %v951_v42  ;;  %965 = vrot.lane.b32.xlu0 %v3396_v41, %s3151_s1 }
 0x244   : > { %v2811_v44 = vpop.f32.mrf.mxu1 }
 0x245   : > { %v3399_v45 = vpack.c.bf16 %v952_v43, %v952_v43 }
 0x247   : > { %1014 = vrot.lane.b32.xlu1 %v3399_v45, %s3151_s1  ;;  %s3161_s1 = smov 72  }
 0x2b5   : > { %v966_v46 = vpop.permute.xlu0 %965 }
 0x2b6   : > { %v972_v47 = vsel %vm967_vm3, %v966_v46, 0 }
 0x2b7   : > { %2813 = vmatpush3.bf16.xpose.msra.mxu1 %v972_v47 }
 0x2b8   : > { %2818 = vmatprep.subr.bf16.mxu1 %v3149_v18 }
 0x2b9   : > { %v1015_v48 = vpop.permute.xlu1 %1014 }
 0x2ba   : > { %v1020_v49 = vsel %vm967_vm3, %v1015_v48, 0 }
 0x2be   : > { %2815 = vmatmul.mubr.msk.bf16.vlgmr.msra.gmra.mxu1 %vm967_vm3, %v3396_v41 }
 0x2bf   : > { %2819 = vmatpush3.bf16.xpose.msra.mxu1 %v1020_v49  ;;  %2820 = vmatprep.mubr.msk.bf16.mxu1 %vm3150_vm2, %v3149_v18 }
 0x2c0   : > { %2824 = vmatprep.subr.bf16.mxu1 %v3149_v18 }
 0x2c6   : > { %2821 = vmatmul.mubr.msk.bf16.vlgmr.msra.gmra.mxu1 %vm967_vm3, %v3399_v45 }
 0x2c7   : > { %2826 = vmatprep.mubr.msk.bf16.mxu1 %vm3150_vm2, %v3149_v18 }
 0x37e   : > { %v1008_v61 = vpop.f32.mrf.mxu1 }
 0x37f   : > { %v1062_v0 = vmul.f32 0.35355338, %v1008_v61 }
 0x380   : > { %v2816_v1 = vpop.f32.mrf.mxu1 }
 0x381   : > { %v1064_v2 = vadd.f32 %v1062_v0, %v3424_v63 }
 0x382   : > { %v1011_v5 = vpop.f32.mrf.mxu1 }
 0x383   : > { %v1066_v6 = vsel %vm967_vm3, %v1064_v2, -inf }
 0x384   : > { %1067 = vmax.xlane.f32.xlu1 %v1066_v6  ;;  %v2817_v7 = vpop.f32.mrf.mxu1 }
 0x386   : > { %v1056_v8 = vpop.f32.mrf.mxu1 }
 0x387   : > { %v1063_v10 = vmul.f32 0.35355338, %v1056_v8 }
 0x388   : > { %v2822_v11 = vpop.f32.mrf.mxu1 }
 0x389   : > { %v1065_v12 = vadd.f32 %v1063_v10, %v3428_v9 }
 0x38a   : > { %v1059_v13 = vpop.f32.mrf.mxu1 }
 0x38b   : > { %v1069_v14 = vsel %vm967_vm3, %v1065_v12, -inf }
 0x38c   : > { %1070 = vmax.xlane.f32.xlu0 %v1069_v14  ;;  %v2823_v15 = vpop.f32.mrf.mxu1 }
 0x395   : > { %1139 = vrot.lane.b32.xlu1 %v3399_v45, %s3154_s26 }
 0x399   : > { %1190 = vrot.lane.b32.xlu1 %v3396_v41, %s3155_s19 }
 0x40d   : > { %v1068_v16 = vpop.xlane.xlu1 %1067 }
 0x40e   : > { %v1072_v17 = vsub.f32 %v1064_v2, %v1068_v16 }
 0x410   : > { %v1074_v19 = vmul.f32 1.442695, %v1072_v17 }
 0x411   : > { %v1140_v20 = vpop.permute.xlu1 %1139 }
 0x412   : > { %3036 = vpow2.f32 %v1074_v19  ;;  %v1145_v21 = vsel %vm1095_vm11, %v1140_v20, 0 }
 0x413   : > { %2831 = vmatpush3.bf16.msra.mxu0 %v1145_v21 }
 0x414   : > { %2842 = vmatprep.subr.bf16.mxu0 %v3149_v18 }
 0x415   : > { %v1071_v22 = vpop.xlane.xlu0 %1070  ;;  %v1191_v30 = vpop.permute.xlu1 %1190 }
 0x416   : > { %v1073_v23 = vsub.f32 %v1065_v12, %v1071_v22  ;;  %v1196_v37 = vsel %vm967_vm3, %v1191_v30, 0 }
 0x418   : > { %v1076_v24 = vmul.f32 1.442695, %v1073_v23 }
 0x41a   : > { %3038 = vpow2.f32 %v1076_v24 }
 0x41f   : > { %v3037_v25 = vpop.eup %3036 }
 0x420   : > { %v1078_v26 = vsel %vm967_vm3, %v3037_v25, 0.0 }
 0x421   : > { %1079 = vadd.xlane.f32.xlu0 %v1078_v26 }
 0x427   : > { %v3039_v27 = vpop.eup %3038 }
 0x428   : > { %v1081_v28 = vsel %vm967_vm3, %v3039_v27, 0.0 }
 0x429   : > { %1082 = vadd.xlane.f32.xlu1 %v1081_v28 }
 0x437   : > { %1090 = vrot.lane.b32.xlu0 %v3396_v41, %s3154_s26  ;;  %s3750_s26 = sld [smem:[#allocation20_spill]] (!%p2723_p11) }
 0x43a   : > { %1240 = vrot.lane.b32.xlu1 %v3399_v45, %s3155_s19 }
 0x43b   : > { %1188 = vrot.lane.b32.xlu0 %v3396_v41, %s3156_s2 }
 0x43e   : > { %1238 = vrot.lane.b32.xlu1 %v3399_v45, %s3156_s2  ;;  %s3751_s2 = sld [smem:[#allocation21_spill]] (!%p2723_p11) }
 0x4aa   : > { %v1080_v29 = vpop.xlane.xlu0 %1079 }
 0x4ab   : > { %3040 = vrcp.f32 %v1080_v29 }
 0x4ae   : > { %v1091_v31 = vpop.permute.xlu0 %1090 }
 0x4af   : > { %v1097_v32 = vsel %vm1095_vm11, %v1091_v31, 0 }
 0x4b0   : > { %2825 = vmatpush3.bf16.msra.mxu1 %v1097_v32  ;;  %v956_v32 = vld [vmem:[%s3319_s23] sm:$0xf] }
 0x4b1   : > { %2836 = vmatprep.subr.bf16.mxu1 %v3149_v18 }
 0x4b2   : > { %v1083_v33 = vpop.xlane.xlu1 %1082  ;;  %v1189_v43 = vpop.permute.xlu0 %1188 }
 0x4b3   : > { %3042 = vrcp.f32 %v1083_v33 }
 0x4b6   : > { %v1241_v40 = vpop.permute.xlu1 %1240 }
 0x4b7   : > { %v1246_v44 = vsel %vm967_vm3, %v1241_v40, 0  ;;  %v957_v40 = vld [vmem:[%s3319_s23 + $0x4] sm:$0xf] }
 0x4b8   : > { %v3041_v34 = vpop.eup %3040 }
 0x4b9   : > { %v1086_v35 = vmul.f32 %v3041_v34, %v3037_v25 }
 0x4ba   : > { %v1239_v46 = vpop.permute.xlu1 %1238 }
 0x4bb   : > { %v1088_v36 = vpack.c.bf16 %v1086_v35, %v1086_v35  ;;  %v1464_v35 = vsel %vm1095_vm11, %v956_v32, 0 }
 0x4bd   : > { %2827 = vmatmul.mubr.msk.bf16.vlgmr.msra.gmra.mxu1 %vm967_vm3, %v1088_v36 }
 0x4be   : > { %2837 = vmatpush3.bf16.xpose.msra.mxu1 %v1196_v37  ;;  %2838 = vmatprep.mubr.msk.bf16.mxu1 %vm3150_vm2, %v3149_v18 }
 0x4bf   : > { %2848 = vmatprep.subr.bf16.mxu1 %v3149_v18 }
 0x4c0   : > { %v3043_v38 = vpop.eup %3042 }
 0x4c1   : > { %v1087_v39 = vmul.f32 %v3043_v38, %v3039_v27 }
 0x4c3   : > { %v1089_v42 = vpack.c.bf16 %v1087_v39, %v1087_v39 }
 0x4c5   : > { %2833 = vmatmul.mubr.msk.bf16.vlgmr.msra.gmra.mxu0 %vm967_vm3, %v1089_v42  ;;  %2839 = vmatmul.mubr.msk.bf16.vlgmr.msra.gmra.mxu1 %vm967_vm3, %v1189_v43  ;;  %v1417_v42 = vsel %vm1095_vm11, %v957_v40, 0 }
 0x4c6   : > { %2843 = vmatpush3.bf16.xpose.msra.mxu0 %v1246_v44  ;;  %2844 = vmatprep.mubr.msk.bf16.mxu0 %vm3150_vm2, %v3149_v18 }
 0x4c7   : > { %2854 = vmatprep.subr.bf16.mxu0 %v3149_v18  ;;  %2850 = vmatprep.mubr.msk.bf16.mxu1 %vm3150_vm2, %v3149_v18 }
 0x4cd   : > { %2845 = vmatmul.mubr.msk.bf16.vlgmr.msra.gmra.mxu0 %vm967_vm3, %v1239_v46 }
 0x4ce   : > { %2856 = vmatprep.mubr.msk.bf16.mxu0 %vm3150_vm2, %v3149_v18 }
 0x57d   : > { %v3460_v47 = vpop.f32.mrf.mxu1 }
 0x57f   : > { %v2828_v48 = vpop.f32.mrf.mxu1 }
 0x581   : > { %v1136_v49 = vpop.f32.mrf.mxu1 }
 0x583   : > { %v2829_v50 = vpop.f32.mrf.mxu1 }
 0x585   : > { %v3462_v51 = vpop.f32.mrf.mxu0  ;;  %v1232_v53 = vpop.f32.mrf.mxu1 }
 0x586   : > { %v1187_v54 = vpack.c.bf16 %v3462_v51, %v3460_v47  ;;  %v1288_v55 = vmul.f32 0.35355338, %v1232_v53 }
 0x587   : > { %v2834_v56 = vpop.f32.mrf.mxu0  ;;  %v2840_v57 = vpop.f32.mrf.mxu1 }
 0x588   : > { %v1290_v58 = vadd.f32 %v1288_v55, %v3424_v63 }
 0x589   : > { %v1184_v59 = vpop.f32.mrf.mxu0  ;;  %v1235_v60 = vpop.f32.mrf.mxu1 }
 0x58a   : > { %v1292_v61 = vsel %vm967_vm3, %v1290_v58, -inf }
 0x58b   : > { %v2835_v62 = vpop.f32.mrf.mxu0  ;;  %1293 = vmax.xlane.f32.xlu0 %v1292_v61  ;;  %v2841_v0 = vpop.f32.mrf.mxu1 }
 0x58d   : > { %v1282_v1 = vpop.f32.mrf.mxu0 }
 0x58e   : > { %v1289_v2 = vmul.f32 0.35355338, %v1282_v1 }
 0x58f   : > { %v2846_v5 = vpop.f32.mrf.mxu0 }
 0x590   : > { %v1291_v6 = vadd.f32 %v1289_v2, %v3428_v9 }
 0x591   : > { %v1285_v7 = vpop.f32.mrf.mxu0 }
 0x592   : > { %v1295_v8 = vsel %vm967_vm3, %v1291_v6, -inf }
 0x593   : > { %1296 = vmax.xlane.f32.xlu1 %v1295_v8  ;;  %v2847_v10 = vpop.f32.mrf.mxu0 }
 0x5a4   : > { %1364 = vrot.lane.b32.xlu1 %v3399_v45, %s3157_s28 }
 0x5a8   : > { %1509 = vrot.lane.b32.xlu1 %v3396_v41, %s3158_s27 }
 0x5ac   : > { %1559 = vrot.lane.b32.xlu1 %v3399_v45, %s3158_s27  ;;  %s2550_s27 = scalar_lea.vmem (!%p2723_p11), [#allocation2], %s2724_s25 }
 0x5b0   : > { %1557 = vrot.lane.b32.xlu1 %v3399_v45, %s3159_s30 }
 0x614   : > { %v1294_v11 = vpop.xlane.xlu0 %1293 }
 0x615   : > { %v1298_v12 = vsub.f32 %v1290_v58, %v1294_v11 }
 0x617   : > { %v1300_v13 = vmul.f32 1.442695, %v1298_v12 }
 0x619   : > { %3044 = vpow2.f32 %v1300_v13 }
 0x61c   : > { %v1297_v14 = vpop.xlane.xlu1 %1296 }
 0x61d   : > { %v1299_v15 = vsub.f32 %v1291_v6, %v1297_v14 }
 0x61f   : > { %v1302_v16 = vmul.f32 1.442695, %v1299_v15 }
 0x620   : > { %v1365_v17 = vpop.permute.xlu1 %1364 }
 0x621   : > { %3046 = vpow2.f32 %v1302_v16  ;;  %v1370_v19 = vsel %vm1095_vm11, %v1365_v17, 0 }
 0x622   : > { %2855 = vmatpush3.bf16.msra.mxu0 %v1370_v19 }
 0x623   : > { %2866 = vmatprep.subr.bf16.mxu0 %v3149_v18 }
 0x624   : > { %v1510_v36 = vpop.permute.xlu1 %1509 }
 0x625   : > { %v1515_v51 = vsel %vm967_vm3, %v1510_v36, 0 }
 0x626   : > { %v3045_v20 = vpop.eup %3044 }
 0x627   : > { %v1304_v21 = vsel %vm967_vm3, %v3045_v20, 0.0 }
 0x628   : > { %1305 = vadd.xlane.f32.xlu0 %v1304_v21  ;;  %v1560_v37 = vpop.permute.xlu1 %1559 }
 0x629   : > { %v1565_v38 = vsel %vm967_vm3, %v1560_v37, 0 }
 0x62c   : > { %v1558_v39 = vpop.permute.xlu1 %1557 }
 0x62e   : > { %v3047_v22 = vpop.eup %3046 }
 0x62f   : > { %v1307_v23 = vsel %vm967_vm3, %v3047_v22, 0.0 }
 0x630   : > { %1308 = vadd.xlane.f32.xlu0 %v1307_v23 }
 0x646   : > { %1316 = vrot.lane.b32.xlu0 %v3396_v41, %s3157_s28  ;;  %s2318_s28 = sld [smem:[#allocation4]] (!%p2723_p11) }
 0x64a   : > { %1507 = vrot.lane.b32.xlu0 %v3396_v41, %s3159_s30 }
 0x6b1   : > { %v1306_v24 = vpop.xlane.xlu0 %1305 }
 0x6b2   : > { %3048 = vrcp.f32 %v1306_v24 }
 0x6b9   : > { %v1309_v25 = vpop.xlane.xlu0 %1308 }
 0x6ba   : > { %3050 = vrcp.f32 %v1309_v25 }
 0x6bd   : > { %v1317_v26 = vpop.permute.xlu0 %1316 }
 0x6be   : > { %v1322_v27 = vsel %vm1095_vm11, %v1317_v26, 0 }
 0x6bf   : > { %v3049_v28 = vpop.eup %3048  ;;  %2849 = vmatpush3.bf16.msra.mxu1 %v1322_v27 }
 0x6c0   : > { %v1312_v29 = vmul.f32 %v3049_v28, %v3045_v20  ;;  %2860 = vmatprep.subr.bf16.mxu1 %v3149_v18 }
 0x6c1   : > { %v1508_v56 = vpop.permute.xlu0 %1507 }
 0x6c2   : > { %v1314_v30 = vpack.c.bf16 %v1312_v29, %v1312_v29 }
 0x6c4   : > { %2851 = vmatmul.mubr.msk.bf16.vlgmr.msra.gmra.mxu1 %vm967_vm3, %v1314_v30 }
 0x6c5   : > { %2862 = vmatprep.mubr.msk.bf16.mxu1 %vm3150_vm2, %v3149_v18  ;;  %2861 = vmatpush3.bf16.msra.mxu1 %v1417_v42 }
 0x6c6   : > { %2872 = vmatprep.subr.bf16.mxu1 %v3149_v18 }
 0x6c7   : > { %v3051_v31 = vpop.eup %3050 }
 0x6c8   : > { %v1313_v33 = vmul.f32 %v3051_v31, %v3047_v22 }
 0x6ca   : > { %v1315_v34 = vpack.c.bf16 %v1313_v33, %v1313_v33 }
 0x6cc   : > { %2857 = vmatmul.mubr.msk.bf16.vlgmr.msra.gmra.mxu0 %vm967_vm3, %v1315_v34 }
 0x6cd   : > { %2867 = vmatpush3.bf16.msra.mxu0 %v1464_v35  ;;  %2868 = vmatprep.mubr.msk.bf16.mxu0 %vm3150_vm2, %v3149_v18 }
 0x6ce   : > { %2878 = vmatprep.subr.bf16.mxu0 %v3149_v18 }
 0x6d4   : > { %2869 = vmatmul.mubr.msk.bf16.vlgmr.msra.gmra.mxu0 %vm967_vm3, %v1187_v54 }
 0x6d5   : > { %2879 = vmatpush3.bf16.xpose.msra.mxu0 %v1565_v38  ;;  %2880 = vmatprep.mubr.msk.bf16.mxu0 %vm3150_vm2, %v3149_v18 }
 0x6d6   : > { %2890 = vmatprep.subr.bf16.mxu0 %v3149_v18 }
 0x6dc   : > { %2881 = vmatmul.mubr.msk.bf16.vlgmr.msra.gmra.mxu0 %vm967_vm3, %v1558_v39 }
 0x6dd   : > { %2892 = vmatprep.mubr.msk.bf16.mxu0 %vm3150_vm2, %v3149_v18 }
 0x784   : > { %v1358_v43 = vpop.f32.mrf.mxu1 }
 0x786   : > { %v2852_v44 = vpop.f32.mrf.mxu1 }
 0x788   : > { %v1361_v46 = vpop.f32.mrf.mxu1 }
 0x78a   : > { %v2853_v47 = vpop.f32.mrf.mxu1 }
 0x78c   : > { %v1406_v48 = vpop.f32.mrf.mxu0 }
 0x78d   : > { %v1412_v49 = vpack.c.bf16 %v1406_v48, %v1358_v43 }
 0x78e   : > { %v2858_v50 = vpop.f32.mrf.mxu0 }
 0x78f   : > { %2863 = vmatmul.mubr.msk.bf16.vlgmr.msra.gmra.mxu1 %vm967_vm3, %v1412_v49  ;;  %v958_v50 = vld [vmem:[%s3319_s23 + $0x8] sm:$0xf] }
 0x790   : > { %2873 = vmatpush3.bf16.xpose.msra.mxu1 %v1515_v51  ;;  %v1409_v53 = vpop.f32.mrf.mxu0  ;;  %2874 = vmatprep.mubr.msk.bf16.mxu1 %vm3150_vm2, %v3149_v18  ;;  %v1736_v51 = vsel %vm1095_vm11, %v958_v50, 0 }
 0x791   : > { %2884 = vmatprep.subr.bf16.mxu1 %v3149_v18 }
 0x792   : > { %v2859_v54 = vpop.f32.mrf.mxu0 }
 0x794   : > { %v3510_v55 = vpop.f32.mrf.mxu0 }
 0x796   : > { %v2870_v57 = vpop.f32.mrf.mxu0 }
 0x797   : > { %2875 = vmatmul.mubr.msk.bf16.vlgmr.msra.gmra.mxu1 %vm967_vm3, %v1508_v56 }
 0x798   : > { %v3513_v58 = vpop.f32.mrf.mxu0  ;;  %2886 = vmatprep.mubr.msk.bf16.mxu1 %vm3150_vm2, %v3149_v18 }
 0x79a   : > { %v2871_v59 = vpop.f32.mrf.mxu0 }
 0x79c   : > { %v1601_v60 = vpop.f32.mrf.mxu0 }
 0x79d   : > { %v1608_v61 = vmul.f32 0.35355338, %v1601_v60 }
 0x79e   : > { %v2882_v62 = vpop.f32.mrf.mxu0 }
 0x79f   : > { %v1610_v0 = vadd.f32 %v1608_v61, %v3428_v9 }
 0x7a0   : > { %v1604_v1 = vpop.f32.mrf.mxu0 }
 0x7a1   : > { %v1614_v2 = vsel %vm967_vm3, %v1610_v0, -inf }
 0x7a2   : > { %1615 = vmax.xlane.f32.xlu1 %v1614_v2  ;;  %v2883_v5 = vpop.f32.mrf.mxu0 }
 0x7b3   : > { %1683 = vrot.lane.b32.xlu1 %v3399_v45, %s3160_s0 }
 0x7b7   : > { %1783 = vrot.lane.b32.xlu1 %v3396_v41, %s3161_s1 }
 0x7bb   : > { %1833 = vrot.lane.b32.xlu1 %v3399_v45, %s3161_s1 }
 0x7bf   : > { %1831 = vrot.lane.b32.xlu1 %v3399_v45, %s3162_s20 }
 0x82b   : > { %v1616_v6 = vpop.xlane.xlu1 %1615 }
 0x82c   : > { %v1618_v10 = vsub.f32 %v1610_v0, %v1616_v6 }
 0x82e   : > { %v1621_v11 = vmul.f32 1.442695, %v1618_v10 }
 0x82f   : > { %v1684_v7 = vpop.permute.xlu1 %1683 }
 0x830   : > { %v1689_v8 = vsel %vm1095_vm11, %v1684_v7, 0  ;;  %3052 = vpow2.f32 %v1621_v11 }
 0x831   : > { %2891 = vmatpush3.bf16.msra.mxu0 %v1689_v8 }
 0x832   : > { %2902 = vmatprep.subr.bf16.mxu0 %v3149_v18 }
 0x833   : > { %v1784_v34 = vpop.permute.xlu1 %1783 }
 0x834   : > { %v1789_v36 = vsel %vm967_vm3, %v1784_v34, 0 }
 0x837   : > { %v1834_v62 = vpop.permute.xlu1 %1833 }
 0x838   : > { %v1839_v5 = vsel %vm967_vm3, %v1834_v62, 0 }
 0x83b   : > { %v1832_v7 = vpop.permute.xlu1 %1831 }
 0x83d   : > { %v3053_v23 = vpop.eup %3052 }
 0x83e   : > { %v1626_v25 = vsel %vm967_vm3, %v3053_v23, 0.0 }
 0x84f   : > { %v3527_v12 = vpop.f32.mrf.mxu1 }
 0x851   : > { %v2864_v13 = vpop.f32.mrf.mxu1 }
 0x853   : > { %v3529_v14 = vpop.f32.mrf.mxu1 }
 0x855   : > { %v2865_v15 = vpop.f32.mrf.mxu1 }
 0x857   : > { %v1551_v16 = vpop.f32.mrf.mxu1 }
 0x858   : > { %v1607_v17 = vmul.f32 0.35355338, %v1551_v16  ;;  %v1501_v16 = vadd.f32 %v3510_v55, %v3527_v12 }
 0x859   : > { %v2876_v19 = vpop.f32.mrf.mxu1 }
 0x85a   : > { %v1609_v20 = vadd.f32 %v1607_v17, %v3424_v63 }
 0x85b   : > { %v1554_v21 = vpop.f32.mrf.mxu1 }
 0x85c   : > { %v1611_v22 = vsel %vm967_vm3, %v1609_v20, -inf  ;;  %v1504_v21 = vadd.f32 %v3513_v58, %v3529_v14 }
 0x85d   : > { %1612 = vmax.xlane.f32.xlu0 %v1611_v22  ;;  %v2877_v24 = vpop.f32.mrf.mxu1 }
 0x861   : > { %1627 = vadd.xlane.f32.xlu0 %v1626_v25 }
 0x8e6   : > { %v1613_v26 = vpop.xlane.xlu0 %1612 }
 0x8e7   : > { %v1617_v27 = vsub.f32 %v1609_v20, %v1613_v26 }
 0x8e9   : > { %v1619_v28 = vmul.f32 1.442695, %v1617_v27 }
 0x8ea   : > { %v1628_v29 = vpop.xlane.xlu0 %1627 }
 0x8eb   : > { %3054 = vpow2.f32 %v1619_v28 }
 0x8ec   : > { %3056 = vrcp.f32 %v1628_v29 }
 0x8f8   : > { %v3055_v30 = vpop.eup %3054 }
 0x8f9   : > { %v3057_v31 = vpop.eup %3056  ;;  %v1623_v32 = vsel %vm967_vm3, %v3055_v30, 0.0 }
 0x8fa   : > { %1624 = vadd.xlane.f32.xlu0 %v1623_v32  ;;  %v1632_v33 = vmul.f32 %v3057_v31, %v3053_v23 }
 0x8fc   : > { %v1634_v35 = vpack.c.bf16 %v1632_v33, %v1632_v33 }
 0x8fe   : > { %2893 = vmatmul.mubr.msk.bf16.vlgmr.msra.gmra.mxu0 %vm967_vm3, %v1634_v35 }
 0x8ff   : > { %2903 = vmatpush3.bf16.xpose.msra.mxu0 %v1789_v36  ;;  %2904 = vmatprep.mubr.msk.bf16.mxu0 %vm3150_vm2, %v3149_v18 }
 0x900   : > { %2914 = vmatprep.subr.bf16.mxu0 %v3149_v18 }
 0x910   : > { %1635 = vrot.lane.b32.xlu0 %v3396_v41, %s3160_s0 }
 0x914   : > { %1781 = vrot.lane.b32.xlu0 %v3396_v41, %s3162_s20 }
 0x983   : > { %v1625_v37 = vpop.xlane.xlu0 %1624 }
 0x984   : > { %3058 = vrcp.f32 %v1625_v37 }
 0x987   : > { %v1636_v38 = vpop.permute.xlu0 %1635 }
 0x988   : > { %v1641_v39 = vsel %vm1095_vm11, %v1636_v38, 0 }
 0x989   : > { %2885 = vmatpush3.bf16.msra.mxu1 %v1641_v39 }
 0x98a   : > { %2896 = vmatprep.subr.bf16.mxu1 %v3149_v18 }
 0x98b   : > { %v1782_v40 = vpop.permute.xlu0 %1781 }
 0x98c   : > { %2905 = vmatmul.mubr.msk.bf16.vlgmr.msra.gmra.mxu0 %vm967_vm3, %v1782_v40 }
 0x98d   : > { %2916 = vmatprep.mubr.msk.bf16.mxu0 %vm3150_vm2, %v3149_v18 }
 0x991   : > { %v3059_v42 = vpop.eup %3058 }
 0x992   : > { %v1631_v43 = vmul.f32 %v3059_v42, %v3055_v30 }
 0x994   : > { %v1633_v44 = vpack.c.bf16 %v1631_v43, %v1631_v43  ;;  %v959_v43 = vld [vmem:[%s3319_s23 + $0xc] sm:$0xf]  ;;  %s3749_s23 = sld [smem:[#allocation19_spill]] (!%p2723_p11) }
 0x996   : > { %2887 = vmatmul.mubr.msk.bf16.vlgmr.msra.gmra.mxu1 %vm967_vm3, %v1633_v44  ;;  %v2010_v44 = vsel %vm1095_vm11, %v959_v43, 0 }
 0x997   : > { %2898 = vmatprep.mubr.msk.bf16.mxu1 %vm3150_vm2, %v3149_v18  ;;  %2897 = vmatpush3.bf16.msra.mxu1 %v1736_v51 }
 0x998   : > { %2908 = vmatprep.subr.bf16.mxu1 %v3149_v18 }
 0x9be   : > { %v1725_v46 = vpop.f32.mrf.mxu0 }
 0x9c0   : > { %v2894_v47 = vpop.f32.mrf.mxu0 }
 0x9c2   : > { %v1728_v48 = vpop.f32.mrf.mxu0 }
 0x9c4   : > { %v2895_v49 = vpop.f32.mrf.mxu0 }
 0xa4c   : > { %v1825_v53 = vpop.f32.mrf.mxu0 }
 0xa4d   : > { %v1881_v54 = vmul.f32 0.35355338, %v1825_v53 }
 0xa4e   : > { %v2906_v56 = vpop.f32.mrf.mxu0 }
 0xa4f   : > { %v1883_v57 = vadd.f32 %v1881_v54, %v3424_v63 }
 0xa50   : > { %v1828_v59 = vpop.f32.mrf.mxu0 }
 0xa51   : > { %v1885_v60 = vsel %vm967_vm3, %v1883_v57, -inf }
 0xa52   : > { %1886 = vmax.xlane.f32.xlu0 %v1885_v60  ;;  %v2907_v61 = vpop.f32.mrf.mxu0  ;;  %v2707_v60 = vld [vmem:[%s3748_s29] ss:$0 sm:$0xff] }
 0xa56   : > { %v1677_v0 = vpop.f32.mrf.mxu1 }
 0xa57   : > { %v1731_v1 = vpack.c.bf16 %v1725_v46, %v1677_v0 }
 0xa58   : > { %v2888_v2 = vpop.f32.mrf.mxu1 }
 0xa59   : > { %2899 = vmatmul.mubr.msk.bf16.vlgmr.msra.gmra.mxu1 %vm967_vm3, %v1731_v1 }
 0xa5a   : > { %2909 = vmatpush3.bf16.xpose.msra.mxu1 %v1839_v5  ;;  %v1680_v6 = vpop.f32.mrf.mxu1  ;;  %2910 = vmatprep.mubr.msk.bf16.mxu1 %vm3150_vm2, %v3149_v18 }
 0xa5b   : > { %2920 = vmatprep.subr.bf16.mxu1 %v3149_v18 }
 0xa5c   : > { %v2889_v63 = vpop.f32.mrf.mxu1 }
 0xa61   : > { %2911 = vmatmul.mubr.msk.bf16.vlgmr.msra.gmra.mxu1 %vm967_vm3, %v1832_v7 }
 0xa62   : > { %2922 = vmatprep.mubr.msk.bf16.mxu1 %vm3150_vm2, %v3149_v18 }
 0xadb   : > { %v1887_v8 = vpop.xlane.xlu0 %1886 }
 0xadc   : > { %v1891_v10 = vsub.f32 %v1883_v57, %v1887_v8 }
 0xade   : > { %v1893_v11 = vmul.f32 1.442695, %v1891_v10 }
 0xae0   : > { %3060 = vpow2.f32 %v1893_v11 }
 0xaed   : > { %v3061_v13 = vpop.eup %3060 }
 0xaee   : > { %v1897_v15 = vsel %vm967_vm3, %v3061_v13, 0.0 }
 0xaef   : > { %1898 = vadd.xlane.f32.xlu0 %v1897_v15 }
 0xb19   : > { %v1772_v17 = vpop.f32.mrf.mxu1 }
 0xb1a   : > { %v1779_v19 = vadd.f32 %v1772_v17, %v1501_v16 }
 0xb1b   : > { %v2900_v20 = vpop.f32.mrf.mxu1 }
 0xb1d   : > { %v1775_v22 = vpop.f32.mrf.mxu1 }
 0xb1e   : > { %v3570_v23 = vadd.f32 %v1775_v22, %v1504_v21  ;;  %v3022_v21 = vld [vmem:[%s3336_s5 + $0x8] sm:$0xff]   ;;  %v3023_v22 = vld [vmem:[%s3336_s5] sm:$0xff]  }
 0xb1f   : > { %v2901_v24 = vpop.f32.mrf.mxu1 }
 0xb21   : > { %v1875_v25 = vpop.f32.mrf.mxu1 }
 0xb22   : > { %v1882_v26 = vmul.f32 0.35355338, %v1875_v25 }
 0xb23   : > { %v2912_v27 = vpop.f32.mrf.mxu1 }
 0xb24   : > { %v1884_v28 = vadd.f32 %v1882_v26, %v3428_v9 }
 0xb25   : > { %v1878_v29 = vpop.f32.mrf.mxu1 }
 0xb26   : > { %v1888_v30 = vsel %vm967_vm3, %v1884_v28, -inf }
 0xb27   : > { %1889 = vmax.xlane.f32.xlu1 %v1888_v30  ;;  %v2913_v55 = vpop.f32.mrf.mxu1 }
 0xb28   : > { %v2708_v55 = vld [vmem:[%s779_s18] ss:$0 sm:$0xff] }
 0xb38   : > { %1957 = vrot.lane.b32.xlu1 %v3399_v45, %s3163_s3 }
 0xb78   : > { %v1899_v34 = vpop.xlane.xlu0 %1898 }
 0xbb0   : > { %v1890_v12 = vpop.xlane.xlu1 %1889 }
 0xbb1   : > { %v1892_v31 = vsub.f32 %v1884_v28, %v1890_v12 }
 0xbb3   : > { %v1895_v58 = vmul.f32 1.442695, %v1892_v31 }
 0xbb4   : > { %v1958_v14 = vpop.permute.xlu1 %1957 }
 0xbb5   : > { %3062 = vpow2.f32 %v1895_v58  ;;  %v1963_v32 = vsel %vm1095_vm11, %v1958_v14, 0  ;;  %v2709_v14 = vld [vmem:[%s782_s13] ss:$0 sm:$0xff] }
 0xbb6   : > { %2921 = vmatpush3.bf16.msra.mxu1 %v1963_v32  ;;  %3064 = vrcp.f32 %v1899_v34 }
 0xbb7   : > { %2932 = vmatprep.subr.bf16.mxu1 %v3149_v18 }
 0xbc2   : > { %v3063_v33 = vpop.eup %3062 }
 0xbc3   : > { %v1900_v9 = vsel %vm967_vm3, %v3063_v33, 0.0  ;;  %v3065_v35 = vpop.eup %3064 }
 0xbc4   : > { %1901 = vadd.xlane.f32.xlu0 %v1900_v9  ;;  %v1905_v36 = vmul.f32 %v3065_v35, %v3061_v13  ;;  %v3024_v35 = vld [vmem:[%s3346_s15 + $0x38] sm:$0xff]  }
 0xbc6   : > { %v1907_v39 = vpack.c.bf16 %v1905_v36, %v1905_v36  ;;  %v3026_v36 = vld [vmem:[%s3346_s15 + $0x28] sm:$0xff]  }
 0xbda   : > { %1909 = vrot.lane.b32.xlu0 %v3396_v41, %s3163_s3 }
 0xc4d   : > { %v1902_v45 = vpop.xlane.xlu0 %1901 }
 0xc4e   : > { %3066 = vrcp.f32 %v1902_v45  ;;  %v3025_v45 = vld [vmem:[%s3346_s15 + $0x30] sm:$0xff]  }
 0xc51   : > { %v1910_v37 = vpop.permute.xlu0 %1909 }
 0xc52   : > { %v1915_v38 = vsel %vm1095_vm11, %v1910_v37, 0  ;;  %v3027_v37 = vld [vmem:[%s3346_s15 + $0x20] sm:$0xff]  }
 0xc53   : > { %2915 = vmatpush3.bf16.msra.mxu0 %v1915_v38  ;;  %v3028_v38 = vld [vmem:[%s3346_s15 + $0x18] sm:$0xff]  }
 0xc54   : > { %2926 = vmatprep.subr.bf16.mxu0 %v3149_v18 }
 0xc56   : > { %2917 = vmatmul.mubr.msk.bf16.vlgmr.msra.gmra.mxu0 %vm967_vm3, %v1907_v39  ;;  %v3029_v39 = vld [vmem:[%s3346_s15 + $0x10] sm:$0xff]  }
 0xc57   : > { %2928 = vmatprep.mubr.msk.bf16.mxu0 %vm3150_vm2, %v3149_v18  ;;  %2927 = vmatpush3.bf16.msra.mxu0 %v2010_v44 }
 0xc58   : > { %2940 = vmatprep.subr.bf16.mxu0 %v3149_v18 }
 0xc5b   : > { %v3067_v41 = vpop.eup %3066 }
 0xc5c   : > { %v1906_v40 = vmul.f32 %v3067_v41, %v3063_v33  ;;  %v3030_v41 = vld [vmem:[%s3346_s15 + $0x8] sm:$0xff]  }
 0xc5e   : > { %v1908_v42 = vpack.c.bf16 %v1906_v40, %v1906_v40  ;;  %v3031_v40 = vld [vmem:[%s3346_s15] sm:$0xff]  }
 0xc60   : > { %2923 = vmatmul.mubr.msk.bf16.vlgmr.msra.gmra.mxu1 %vm967_vm3, %v1908_v42  ;;  %v2710_v42 = vld [vmem:[%s790_s7] ss:$0 sm:$0xff] }
 0xc61   : > { %2936 = vmatprep.mubr.msk.bf16.mxu1 %vm3150_vm2, %v3149_v18  ;;  %2933 = vmatpush3.bf16.msra.mxu1 %v3022_v21 }
 0xc62   : > { %2934 = vmatprep.subr.bf16.mxu1 %v3149_v18 }
 0xc65   : > { %2935 = vmatpush3.bf16.msra.mxu1 %v3023_v22 }
 0xd16   : > { %v1951_v46 = vpop.f32.mrf.mxu0 }
 0xd18   : > { %v2918_v47 = vpop.f32.mrf.mxu0 }
 0xd1a   : > { %v1954_v48 = vpop.f32.mrf.mxu0 }
 0xd1c   : > { %v2919_v49 = vpop.f32.mrf.mxu0 }
 0xd20   : > { %v1999_v50 = vpop.f32.mrf.mxu1 }
 0xd21   : > { %v2005_v51 = vpack.c.bf16 %v1999_v50, %v1951_v46 }
 0xd22   : > { %v2924_v53 = vpop.f32.mrf.mxu1 }
 0xd23   : > { %2929 = vmatmul.mubr.msk.bf16.vlgmr.msra.gmra.mxu0 %vm967_vm3, %v2005_v51 }
 0xd24   : > { %v2002_v54 = vpop.f32.mrf.mxu1  ;;  %2956 = vmatprep.mubr.msk.bf16.mxu0 %vm3150_vm2, %v3149_v18  ;;  %2941 = vmatpush3.bf16.msra.mxu0 %v3024_v35 }
 0xd25   : > { %2942 = vmatprep.subr.bf16.mxu0 %v3149_v18 }
 0xd26   : > { %v2925_v56 = vpop.f32.mrf.mxu1 }
 0xd28   : > { %2943 = vmatpush3.bf16.msra.mxu0 %v3025_v45 }
 0xd29   : > { %2944 = vmatprep.subr.bf16.mxu0 %v3149_v18 }
 0xd2c   : > { %2945 = vmatpush3.bf16.msra.mxu0 %v3026_v36 }
 0xd2d   : > { %2946 = vmatprep.subr.bf16.mxu0 %v3149_v18 }
 0xd30   : > { %2947 = vmatpush3.bf16.msra.mxu0 %v3027_v37 }
 0xd31   : > { %2948 = vmatprep.subr.bf16.mxu0 %v3149_v18 }
 0xd34   : > { %2949 = vmatpush3.bf16.msra.mxu0 %v3028_v38 }
 0xd35   : > { %2950 = vmatprep.subr.bf16.mxu0 %v3149_v18 }
 0xd38   : > { %2951 = vmatpush3.bf16.msra.mxu0 %v3029_v39 }
 0xd39   : > { %2952 = vmatprep.subr.bf16.mxu0 %v3149_v18 }
 0xd3c   : > { %2953 = vmatpush3.bf16.msra.mxu0 %v3030_v41 }
 0xd3d   : > { %2954 = vmatprep.subr.bf16.mxu0 %v3149_v18 }
 0xd40   : > { %2955 = vmatpush3.bf16.msra.mxu0 %v3031_v40 }
 0xde3   : > { %v2046_v57 = vpop.f32.mrf.mxu0 }
 0xde4   : > { %v2053_v59 = vadd.f32 %v2046_v57, %v1779_v19 }
 0xde5   : > { %v2930_v61 = vpop.f32.mrf.mxu0 }
 0xde6   : > { %v2055_v62 = vadd.f32 %v2053_v59, %v3356_v3 }
 0xde7   : > { %v2049_v0 = vpop.f32.mrf.mxu0 }
 0xde8   : > { %v3599_v1 = vadd.f32 %v2707_v60, %v2055_v62  ;;  %v2054_v2 = vadd.f32 %v2049_v0, %v3570_v23 }
 0xde9   : > { %v2931_v5 = vpop.f32.mrf.mxu0 }
 0xdea   : > { %v2056_v6 = vadd.f32 %v2054_v2, %v3358_v4  ;;  %v2068_v63 = vsel %vm843_vm1, %v3599_v1, 0.0 }
 0xdeb   : > { %2069 = vadd.xlane.f32.xlu1 %v2068_v63 }
 0xdec   : > { %v3605_v7 = vadd.f32 %v2707_v60, %v2056_v6 }
 0xdee   : > { %v2071_v8 = vsel %vm843_vm1, %v3605_v7, 0.0 }
 0xdef   : > { %2072 = vadd.xlane.f32.xlu0 %v2071_v8 }
 0xe74   : > { %v2070_v3 = vpop.xlane.xlu1 %2069 }
 0xe75   : > { %v2074_v10 = vmul.f32 0.03125, %v2070_v3 }
 0xe77   : > { %v2076_v11 = vsub.f32 %v3599_v1, %v2074_v10 }
 0xe78   : > { %v2073_v13 = vpop.xlane.xlu0 %2072 }
 0xe79   : > { %v2075_v15 = vmul.f32 0.03125, %v2073_v13  ;;  %v2078_v16 = vmul.f32 %v2076_v11, %v2076_v11 }
 0xe7b   : > { %v2077_v4 = vsub.f32 %v3605_v7, %v2075_v15  ;;  %v2080_v17 = vsel %vm843_vm1, %v2078_v16, 0.0 }
 0xe7c   : > { %2081 = vadd.xlane.f32.xlu0 %v2080_v17 }
 0xe7d   : > { %v2079_v19 = vmul.f32 %v2077_v4, %v2077_v4 }
 0xe7f   : > { %v2083_v20 = vsel %vm843_vm1, %v2079_v19, 0.0 }
 0xe80   : > { %2084 = vadd.xlane.f32.xlu1 %v2083_v20 }
 0xf05   : > { %v2082_v23 = vpop.xlane.xlu0 %2081 }
 0xf06   : > { %v2086_v24 = vmul.f32 0.03125, %v2082_v23 }
 0xf08   : > { %v2088_v25 = vadd.f32 1e-05, %v2086_v24 }
 0xf09   : > { %v2085_v26 = vpop.xlane.xlu1 %2084 }
 0xf0a   : > { %3068 = vrsqrt.f32 %v2088_v25  ;;  %v2087_v27 = vmul.f32 0.03125, %v2085_v26 }
 0xf0c   : > { %v2089_v28 = vadd.f32 1e-05, %v2087_v27 }
 0xf0e   : > { %3070 = vrsqrt.f32 %v2089_v28 }
 0xf17   : > { %v3069_v29 = vpop.eup %3068 }
 0xf18   : > { %v2092_v30 = vmul.f32 %v3069_v29, %v2076_v11  ;;  %v2714_v11 = vld [vmem:[%s798_s21] ss:$0 sm:$0xff]  ;;  %s2319_s21 = scalar_lea.vmem (!%p2723_p11), [#allocation2], %s2318_s28 }
 0xf1a   : > { %v2100_v58 = vmul.f32 %v2708_v55, %v2092_v30 }
 0xf1b   : > { %v3071_v12 = vpop.eup %3070 }
 0xf1c   : > { %v2093_v31 = vmul.f32 %v3071_v12, %v2077_v4  ;;  %v2108_v33 = vadd.f32 %v2709_v14, %v2100_v58 }
 0xf1e   : > { %v2101_v32 = vmul.f32 %v2708_v55, %v2093_v31 }
 0xf20   : > { %v2109_v9 = vadd.f32 %v2709_v14, %v2101_v32 }
 0xf22   : > { %v2110_v34 = vpack.c.bf16 %v2109_v9, %v2108_v33 }
 0xf24   : > { %2937 = vmatmul.mubr.msk.bf16.vlgmr.msra.gmra.mxu1 %vm843_vm1, %v2110_v34 }
 0xfe4   : > { %v2171_v43 = vpop.f32.mrf.mxu1 }
 0xfe5   : > { %v2172_v44 = vadd.f32 %v2710_v42, %v2171_v43 }
 0xfe6   : > { %v2938_v46 = vpop.f32.mrf.mxu1 }
 0xfe7   : > { %v2180_v47 = vmul.f32 0.044715, %v2172_v44  ;;  %v2178_v5 = vmul.f32 0.5, %v2172_v44 }
 0xfe8   : > { %v2174_v48 = vpop.f32.mrf.mxu1 }
 0xfe9   : > { %v2182_v49 = vmul.f32 %v2180_v47, %v2172_v44  ;;  %v2175_v50 = vadd.f32 %v2710_v42, %v2174_v48 }
 0xfea   : > { %v2939_v51 = vpop.f32.mrf.mxu1 }
 0xfeb   : > { %v2184_v53 = vmul.f32 %v2182_v49, %v2172_v44  ;;  %v2181_v54 = vmul.f32 0.044715, %v2175_v50  ;;  %v2179_v6 = vmul.f32 0.5, %v2175_v50 }
 0xfed   : > { %v2186_v56 = vadd.f32 %v2184_v53, %v2172_v44  ;;  %v2183_v57 = vmul.f32 %v2181_v54, %v2175_v50 }
 0xfef   : > { %v2188_v59 = vmul.f32 0.7978846, %v2186_v56  ;;  %v2185_v18 = vmul.f32 %v2183_v57, %v2175_v50 }
 0xff1   : > { %3072 = vtanh.f32 %v2188_v59  ;;  %v2187_v60 = vadd.f32 %v2185_v18, %v2175_v50 }
 0xff3   : > { %v2189_v61 = vmul.f32 0.7978846, %v2187_v60 }
 0xff5   : > { %3074 = vtanh.f32 %v2189_v61 }
 0xffe   : > { %v3073_v62 = vpop.eup %3072 }
 0xfff   : > { %v2192_v0 = vadd.f32 1.0, %v3073_v62 }
0x1001   : > { %v2194_v8 = vmul.f32 %v2192_v0, %v2178_v5 }
0x1002   : > { %v3075_v2 = vpop.eup %3074 }
0x1003   : > { %v2193_v63 = vadd.f32 1.0, %v3075_v2 }
0x1005   : > { %v2195_v3 = vmul.f32 %v2193_v63, %v2179_v6 }
0x1007   : > { %v2196_v10 = vpack.c.bf16 %v2195_v3, %v2194_v8 }
0x1009   : > { %2957 = vmatmul.mubr.bf16.vlgmr.msra.gmra.mxu0 %v2196_v10 }
0x10c9   : > { %v2302_v13 = vpop.f32.mrf.mxu0 }
0x10ca   : > { %v2303_v15 = vadd.f32 %v2714_v11, %v2302_v13 }
0x10cb   : > { %v2958_v16 = vpop.f32.mrf.mxu0 }
0x10cc   : > { %v2309_v4 = vadd.f32 %v2303_v15, %v3599_v1 }
0x10cd   : > { %v2305_v17 = vpop.f32.mrf.mxu0 }
0x10ce   : > { %2311 = vst.msk [vmem:[#allocation2] sm:$0xff] %vm843_vm1, %v2309_v4  ;;  %v2306_v19 = vadd.f32 %v2714_v11, %v2305_v17  ;;  %2316 = sbr.rel (%p2723_p11) target bundleno = 4988 (0x137c), region = 100 }
0x10cf   : > { %v2959_v20 = vpop.f32.mrf.mxu0 }
0x10d0   : > { %v2310_v21 = vadd.f32 %v2306_v19, %v3605_v7 }
0x10d2   : > { %2312 = vst.msk [vmem:[#allocation2 + $0x8] sm:$0xff] %vm843_vm1, %v2310_v21 }
0x10d3   : > { %vm2329_vm12 = vcmask 1040384   ;;  %vm2333_vm13 = vcmask 254976   ;;  %v3076_v30 = vld [vmem:[%s3717_s17 + $0x8] sm:$0xff]   ;;  %v3164_v55 = vmov 0.0   ;;  %vm3165_vm14 = vmmov 0   ;;  %v3077_v12 = vld [vmem:[%s3717_s17] sm:$0xff]  }
0x10d4   : > { %2960 = vmatprep.subr.bf16.mxu0 %v3164_v55  ;;  %2964 = vmatprep.mubr.msk.bf16.mxu0 %vm3165_vm14, %v3164_v55  ;;  %v2726_v33 = vld [vmem:[%s3749_s23] ss:$0 sm:$0xff]  ;;  %vm2429_vm15 = vcmask 123904   ;;  %v3166_v48 = vmov 1966171168   ;;  %vm2461_vm0 = vcmask 122880  }
0x10d5   : > { %2961 = vmatpush3.bf16.msra.mxu0 %v3076_v30  ;;  %v2727_v34 = vld [vmem:[%s3750_s26] ss:$0 sm:$0xff]  ;;  %v2438_v49 = vunpack.c.l.s4 %v3166_v48 }
0x10d6   : > { %2962 = vmatprep.subr.bf16.mxu0 %v3164_v55  ;;  %v2728_v37 = vld [vmem:[%s3751_s2] ss:$0 sm:$0xff] }
0x10d7   : > { %v2439_v50 = vunpack.c.0.s8 %v2438_v49 }
0x10d9   : > { %v2320_v22 = vld [vmem:[%s2319_s21] sm:$0x1]  ;;  %v2725_v23 = vld [vmem:[%s2550_s27 + $0x8] sm:$0x1]  ;;  %2963 = vmatpush3.bf16.msra.mxu0 %v3077_v12  ;;  %v2442_v51 = vsub.s32 %v2439_v50, %v3417_v52 }
0x10da   : > { %v2327_v1 = vrot.slane %v2725_v23, 7 }
0x10dc   : > { %v2330_v24 = vsel %vm2329_vm12, %v2320_v22, %v2327_v1 }
0x10dd   : > { %v2334_v25 = vsel %vm2333_vm13, %v2330_v24, 0.0 }
0x10de   : > { %2335 = vadd.xlane.f32.xlu0 %v2334_v25 }
0x1167   : > { %v2336_v26 = vpop.xlane.xlu0 %2335 }
0x1168   : > { %v2337_v27 = vmul.f32 0.03125, %v2336_v26 }
0x116a   : > { %v2338_v7 = vsub.f32 %v2330_v24, %v2337_v27 }
0x116c   : > { %v2339_v28 = vmul.f32 %v2338_v7, %v2338_v7 }
0x116e   : > { %v2340_v29 = vsel %vm2333_vm13, %v2339_v28, 0.0 }
0x116f   : > { %2341 = vadd.xlane.f32.xlu0 %v2340_v29 }
0x11f8   : > { %v2342_v31 = vpop.xlane.xlu0 %2341 }
0x11f9   : > { %v2343_v58 = vmul.f32 0.03125, %v2342_v31 }
0x11fb   : > { %v2344_v14 = vadd.f32 1e-05, %v2343_v58 }
0x11fd   : > { %3078 = vrsqrt.f32 %v2344_v14 }
0x120a   : > { %v3079_v32 = vpop.eup %3078 }
0x120b   : > { %v2346_v9 = vmul.f32 %v3079_v32, %v2338_v7 }
0x120d   : > { %v2353_v35 = vmul.f32 %v2726_v33, %v2346_v9 }
0x120f   : > { %v2360_v45 = vadd.f32 %v2727_v34, %v2353_v35 }
0x1211   : > { %v2361_v36 = vpack.c.bf16 %v2360_v45, %v2360_v45 }
0x1213   : > { %2965 = vmatmul.mubr.msk.bf16.vlgmr.msra.gmra.mxu0 %vm843_vm1, %v2361_v36 }
0x12d3   : > { %v2422_v38 = vpop.f32.mrf.mxu0 }
0x12d4   : > { %v2423_v39 = vadd.f32 %v2728_v37, %v2422_v38 }
0x12d5   : > { %v2966_v41 = vpop.f32.mrf.mxu0 }
0x12d6   : > { %v2428_v40 = vmul.f32 %v2423_v39, %v2423_v39 }
0x12d7   : > { %v2425_v42 = vpop.f32.mrf.mxu0 }
0x12d8   : > { %v2430_v43 = vsel %vm2429_vm15, %v2428_v40, 0.0 }
0x12d9   : > { %2431 = vadd.xlane.f32.xlu1 %v2430_v43  ;;  %v2967_v44 = vpop.f32.mrf.mxu0 }
0x1362   : > { %v2432_v46 = vpop.xlane.xlu1 %2431 }
0x1363   : > { %v2433_v47 = vmax.f32 %v2432_v46, 1e-24 }
0x1365   : > { %3080 = vrsqrt.f32 %v2433_v47 }
0x1372   : > { %v3081_v53 = vpop.eup %3080 }
0x1373   : > { %v2435_v54 = vmul.f32 %v3081_v53, %v2423_v39 }
0x1375   : > { %v2443_v56 = vrot.slane %v2435_v54, %v2442_v51 }
0x1377   : > { %v2444_v57 = vcombine.high %v2443_v56, %v2443_v56  ;;  %v2451_v59 = vrot.slane %v2443_v56, %v2442_v51 }
0x1379   : > { %v2458_v18 = vrot.slane %v2444_v57, %v2442_v51  ;;  %2462 = vst.msk [vmem:[#allocation5] sm:$0x1] %vm2461_vm0, %v2451_v59 }
0x137b   : > { %2463 = vst.msk [vmem:[#allocation5 + $0x1] sm:$0x1] %vm2461_vm0, %v2458_v18 }
0x137c PF: > { %s3752_s18 = sld [smem:[#allocation10_spill]]  ;;  %s3167_s15 = smov [#allocation5]  }
0x137d   : > { %s2473_s28 = sshll.u32 %s3167_s15, 4  ;;  %s2474_s28 = int_to_ptr.vmem [resolvable:$true] %s2473_s28 }
0x137e   : > { %s3094_s25 = scalar_lea.vmem %s2474_s28, 32  ;;  %p3101_p2 = scmp.lt.s32.totalorder %s2474_s28, %s2474_s28 }
0x137f   : > { %p3095_p13 = scmp.ne.s32.totalorder %s2474_s28, %s3094_s25  ;;  %p3102_p3 = scmp.lt.s32.totalorder %s3094_s25, %s3094_s25 }
0x1381   : > { %p3103_p4 = por %p3102_p3, %p3101_p2 }
0x1382   : > { %s3753_s13 = sadd.s32 4294967295, %s3752_s18  }
0x1383   : > { %p3676_p12 = scmp.eq.s32.totalorder %s3753_s13, 1 }
0x1385   : > { %p3096_p0 = pnand %p3095_p13, %p3676_p12 }
0x1387   : > { %p3097_p1 = pneg %p3096_p0 }
0x1389   : > { %p3104_p5 = pnand %p3103_p4, %p3097_p1 }
0x138b   : > { %3107 = shalt.err (!%p3104_p5)
}
0x138c   : > { %s3168_s21 = smov 16   ;;  %s3169_s27 = smov 1  }
0x138d   : > { %s3755_s0 = sld [smem:[#allocation22_spill]] }
0x1393   : > { %2969 = dma.vmem_to_hbm [thread:$0]  (%p3676_p12), %s2474_s28, 32, %s3755_s0, [#allocation6], %s3168_s21, %s3168_s21, %s3169_s27  }
0x1394   : > { %3133 = dma.done.wait (%p3676_p12), [#allocation6], 32  }
0x1395   : > { %3135 = vsyncadd (%p3676_p12), [#allocation6], 4294967264 }
0x1396 PF: > { %s3756_s1 = sld [smem:[#allocation10_spill]] }
0x1397   : > { %s3757_s22 = sld [smem:[#allocation9_spill]] }
0x1398   : > { %s3758_s2 = sld [smem:[#allocation11_spill]] }
0x139c   : > { %s36_s23 = sadd.s32 1, %s3756_s1  }
0x139d   : > { %p33_p6 = scmp.ge.s32.totalorder %s36_s23, 4  }
0x139f   :  { %35 = sbr.rel (!%p33_p6) target bundleno = 34 (0x22), region = 169 }
0x13a4   :  { %2489 = vsyncpa [#allocation6], 1 }
0x13a5   :  { %2491 = vsyncpa [#allocation6 + $0x1], 1 }

</bundles_post_ra>
